<compile_context>
chip_gen: v6e
topology: v6e:2x2x1
jax: 0.10.0
libtpu: 0.0.40
codegen_flags: <defaults>
</compile_context>

<pallas_src>
import functools

import jax
import jax.numpy as jnp
from jax.experimental import pallas as pl
from jax.experimental.pallas import tpu as pltpu

CP = 128          # lane-dense padded width for every channel / hidden dim
_PL = 8           # left halo offset inside the depthwise scratch (sublane-aligned)


# ----------------------------------------------------------------------------
# Fused inverted-bottleneck kernel (one grid step == one batch image)
# ----------------------------------------------------------------------------
def _fused_ib_kernel(*refs, n_in, H, W):
    x_refs = refs[0:n_in]
    w1_refs = refs[n_in:2 * n_in]
    (s1_ref, b1_ref, wd_ref, sd_ref, bd_ref,
     w2_ref, s2_ref, b2_ref) = refs[2 * n_in:2 * n_in + 8]
    wsc_refs = refs[2 * n_in + 8:3 * n_in + 8]
    ssc_ref, bsc_ref = refs[3 * n_in + 8:3 * n_in + 10]
    o_ref = refs[3 * n_in + 10]
    xp_scr = refs[3 * n_in + 11]          # VMEM scratch (H+2, W+16, HP)

    HP = w2_ref.shape[0]
    CPo = o_ref.shape[-1]
    M = H * W

    # f32 activations, flattened to (M, CP) for the MXU.
    xs = [r[...].reshape(M, r.shape[-1]) for r in x_refs]

    # ---- 1x1 expand (channel concat folded as split matmuls) + BN + ReLU6 ---
    hid = jnp.zeros((M, HP), jnp.float32)
    for i in range(n_in):
        hid = hid + jnp.dot(xs[i].astype(jnp.bfloat16), w1_refs[i][...],
                            preferred_element_type=jnp.float32)
    hid = jnp.clip(hid * s1_ref[...] + b1_ref[...], 0.0, 6.0)

    # ---- 3x3 depthwise conv (stride 1), halo built in a VMEM scratch --------
    xp_scr[...] = jnp.zeros_like(xp_scr)
    xp_scr[1:H + 1, _PL:_PL + W, :] = hid.reshape(H, W, HP)  # aligned store
    wd = wd_ref[...]
    acc = jnp.zeros((H, W, HP), jnp.float32)
    for ky in range(3):
        for kx in range(3):
            win = xp_scr[ky:ky + H, _PL - 1 + kx:_PL - 1 + kx + W, :]
            acc = acc + win * wd[ky * 3 + kx, :]
    dw = jnp.clip(acc.reshape(M, HP) * sd_ref[...] + bd_ref[...], 0.0, 6.0)

    # ---- shortcut: identity-concat or 1x1 conv, both as (split) matmuls -----
    sc = jnp.zeros((M, CPo), jnp.float32)
    for i in range(n_in):
        sc = sc + jnp.dot(xs[i].astype(jnp.bfloat16), wsc_refs[i][...],
                          preferred_element_type=jnp.float32)
    sc = sc * ssc_ref[...] + bsc_ref[...]

    # ---- 1x1 project + BN + residual add ------------------------------------
    out = jnp.dot(dw.astype(jnp.bfloat16), w2_ref[...],
                  preferred_element_type=jnp.float32)
    out = out * s2_ref[...] + b2_ref[...] + sc
    o_ref[...] = out.reshape(1, H, W, CPo).astype(o_ref.dtype)


def fused_inverted_bottleneck(xs, p):
    """One fused inverted-bottleneck block.

    xs: list of NHWC inputs, channel-padded to CP (their real channels, in
        order, are the logical concatenated input of the block).
    p : packed (padded / split / bf16) parameters, see pack_block_params.
    """
    n_in = len(xs)
    N, H, W, cp = xs[0].shape
    hp = p["w2"].shape[0]
    cpo = p["w2"].shape[1]

    weights = (list(p["w1"])
               + [p["s1"], p["b1"], p["wd"], p["sd"], p["bd"],
                  p["w2"], p["s2"], p["b2"]]
               + list(p["wsc"]) + [p["ssc"], p["bsc"]])
    args = list(xs) + weights

    def resident(a):
        nd = a.ndim
        return pl.BlockSpec(a.shape, lambda n, _nd=nd: (0,) * _nd)

    in_specs = ([pl.BlockSpec((1, H, W, cp), lambda n: (n, 0, 0, 0))
                 for _ in xs]
                + [resident(a) for a in weights])

    m_total = N * H * W
    flops = (2 * m_total * cp * hp * n_in            # expand
             + 2 * m_total * 9 * hp                  # depthwise
             + 2 * m_total * cp * cpo * n_in         # shortcut
             + 2 * m_total * hp * cpo)               # project
    bytes_accessed = (sum(int(a.size) * a.dtype.itemsize for a in args)
                      + m_total * cpo * 4)

    return pl.pallas_call(
        functools.partial(_fused_ib_kernel, n_in=n_in, H=H, W=W),
        grid=(N,),
        out_shape=jax.ShapeDtypeStruct((N, H, W, cpo), jnp.float32),
        in_specs=in_specs,
        out_specs=pl.BlockSpec((1, H, W, cpo), lambda n: (n, 0, 0, 0)),
        scratch_shapes=[pltpu.VMEM((H + 2, W + 16, hp), jnp.float32)],
        compiler_params=pltpu.CompilerParams(
            dimension_semantics=("parallel",),
            vmem_limit_bytes=32 * 1024 * 1024),
        cost_estimate=pl.CostEstimate(
            flops=int(flops), transcendentals=0,
            bytes_accessed=int(bytes_accessed)),
    )(*args)


# ----------------------------------------------------------------------------
# Parameter packing (pad channels to CP, split weights per input, bf16 weights)
# ----------------------------------------------------------------------------
def _pad2(a, rows, cols, dtype=jnp.float32):
    out = jnp.zeros((rows, cols), jnp.float32)
    out = out.at[:a.shape[0], :a.shape[1]].set(a)
    return out.astype(dtype)


def _pad_vec(v, cols=CP):
    return _pad2(v.reshape(1, -1), 1, cols)


def pack_block_params(lp, in_splits, cp=CP):
    hidden = lp["w1"].shape[1]
    cout = lp["w2"].shape[1]
    assert hidden <= cp and cout <= cp and all(c <= cp for c in in_splits)
    assert sum(in_splits) == lp["w1"].shape[0]

    w1_parts, off = [], 0
    for c in in_splits:
        w1_parts.append(_pad2(lp["w1"][off:off + c, :], cp, cp, jnp.bfloat16))
        off += c

    if "wsc" in lp:                       # 1x1 conv shortcut (+ BN)
        wsc_parts, off = [], 0
        for c in in_splits:
            wsc_parts.append(_pad2(lp["wsc"][off:off + c, :], cp, cp,
                                   jnp.bfloat16))
            off += c
        ssc, bsc = _pad_vec(lp["ssc"]), _pad_vec(lp["bsc"])
    else:                                 # identity shortcut == channel concat
        wsc_parts, off = [], 0
        for c in in_splits:
            sel = jnp.zeros((cp, cp), jnp.float32)
            sel = sel.at[jnp.arange(c), off + jnp.arange(c)].set(1.0)
            wsc_parts.append(sel.astype(jnp.bfloat16))
            off += c
        ssc = jnp.ones((1, cp), jnp.float32)
        bsc = jnp.zeros((1, cp), jnp.float32)

    return {
        "w1": tuple(w1_parts),
        "s1": _pad_vec(lp["s1"]), "b1": _pad_vec(lp["b1"]),
        "wd": _pad2(lp["wd"], 9, cp),
        "sd": _pad_vec(lp["sd"]), "bd": _pad_vec(lp["bd"]),
        "w2": _pad2(lp["w2"], cp, cp, jnp.bfloat16),
        "s2": _pad_vec(lp["s2"]), "b2": _pad_vec(lp["b2"]),
        "wsc": tuple(wsc_parts),
        "ssc": ssc, "bsc": bsc,
    }


# ----------------------------------------------------------------------------
# FEBlock3n2s forward
# ----------------------------------------------------------------------------
def _pad_channels(x, cp=CP):
    c = x.shape[-1]
    return jnp.pad(x, ((0, 0),) * (x.ndim - 1) + ((0, cp - c),))


def feblock3n2s_forward(x_nchw, packed_params, *, G, out_planes):
    # TODO(synk): fold the boundary NCHW<->NHWC transposes / channel padding
    # into the first/last fused kernel's index_maps (tiny tensors, kept in XLA).
    x = jnp.transpose(x_nchw, (0, 2, 3, 1))          # NCHW -> NHWC
    g1 = _pad_channels(x[..., : 2 * G])
    g2 = _pad_channels(x[..., 2 * G: 3 * G])
    g3 = _pad_channels(x[..., 3 * G:])

    y = fused_inverted_bottleneck([g3], packed_params["res1"])       # ResIBSSL(G, G)
    y = fused_inverted_bottleneck([g2, y], packed_params["res2"])    # cat + ResIBSSL(2G, 2G)
    y = fused_inverted_bottleneck([g1, y], packed_params["ibpool"])  # cat + IBPool(in, out)

    y = y[..., :out_planes]
    return jnp.transpose(y, (0, 3, 1, 2))            # NHWC -> NCHW


# ----------------------------------------------------------------------------
# Deterministic logical parameters + pure-JAX reference (same mixed precision)
# ----------------------------------------------------------------------------
def make_logical_block_params(key, cin, cout, expansion):
    hidden = cin * expansion
    k1, k2, k3, k4 = jax.random.split(key, 4)

    def conv_w(k, ci, co):
        return jax.random.normal(k, (ci, co), jnp.float32) / jnp.sqrt(float(ci))

    p = {
        "w1": conv_w(k1, cin, hidden),
        "s1": jnp.ones((hidden,), jnp.float32),
        "b1": jnp.zeros((hidden,), jnp.float32),
        "wd": jax.random.normal(k2, (9, hidden), jnp.float32) / 3.0,
        "sd": jnp.ones((hidden,), jnp.float32),
        "bd": jnp.zeros((hidden,), jnp.float32),
        "w2": conv_w(k3, hidden, cout),
        "s2": jnp.ones((cout,), jnp.float32),
        "b2": jnp.zeros((cout,), jnp.float32),
    }
    if cin != cout:
        p["wsc"] = conv_w(k4, cin, cout)
        p["ssc"] = jnp.ones((cout,), jnp.float32)
        p["bsc"] = jnp.zeros((cout,), jnp.float32)
    return p


def _ref_bottleneck(x, lp):
    bf = jnp.bfloat16
    n, h, w, cin = x.shape
    xm = x.reshape(n * h * w, cin)
    hid = jnp.dot(xm.astype(bf), lp["w1"].astype(bf),
                  preferred_element_type=jnp.float32)
    hid = jnp.clip(hid * lp["s1"] + lp["b1"], 0.0, 6.0)
    hidden = hid.shape[-1]
    hs = hid.reshape(n, h, w, hidden)
    hp = jnp.pad(hs, ((0, 0), (1, 1), (1, 1), (0, 0)))
    acc = jnp.zeros_like(hs)
    for ky in range(3):
        for kx in range(3):
            acc = acc + hp[:, ky:ky + h, kx:kx + w, :] * lp["wd"][ky * 3 + kx]
    dw = jnp.clip(acc * lp["sd"] + lp["bd"], 0.0, 6.0).reshape(n * h * w, hidden)
    if "wsc" in lp:
        sc = (jnp.dot(xm.astype(bf), lp["wsc"].astype(bf),
                      preferred_element_type=jnp.float32)
              * lp["ssc"] + lp["bsc"])
    else:
        sc = xm.astype(bf).astype(jnp.float32)   # mirrors kernel's bf16 matmul path
    out = jnp.dot(dw.astype(bf), lp["w2"].astype(bf),
                  preferred_element_type=jnp.float32)
    out = out * lp["s2"] + lp["b2"] + sc
    return out.reshape(n, h, w, -1)


def ref_forward(x_nchw, logical_params, G):
    x = jnp.transpose(x_nchw, (0, 2, 3, 1))
    g1, g2, g3 = x[..., :2 * G], x[..., 2 * G:3 * G], x[..., 3 * G:]
    y = _ref_bottleneck(g3, logical_params["res1"])
    y = _ref_bottleneck(jnp.concatenate([g2, y], axis=-1), logical_params["res2"])
    y = _ref_bottleneck(jnp.concatenate([g1, y], axis=-1), logical_params["ibpool"])
    return jnp.transpose(y, (0, 3, 1, 2))


# ----------------------------------------------------------------------------
if __name__ == "__main__":
    key = jax.random.PRNGKey(0)
    N, in_planes, H, W = 2, 16, 8, 8
    out_planes, expansion = 24, 6
    G = in_planes // 4

    kx, kp1, kp2, kp3 = jax.random.split(key, 4)
    x = jax.random.normal(kx, (N, in_planes, H, W), jnp.float32)

    logical = {
        "res1": make_logical_block_params(kp1, G, G, expansion),
        "res2": make_logical_block_params(kp2, 2 * G, 2 * G, expansion),
        "ibpool": make_logical_block_params(kp3, in_planes, out_planes, expansion),
    }
    packed = {
        "res1": pack_block_params(logical["res1"], (G,)),
        "res2": pack_block_params(logical["res2"], (G, G)),
        "ibpool": pack_block_params(logical["ibpool"], (2 * G, 2 * G)),
    }

    fwd = jax.jit(functools.partial(feblock3n2s_forward, G=G,
                                    out_planes=out_planes))
    out = fwd(x, packed)
    jax.block_until_ready(out)

    assert out.shape == (N, out_planes, H, W), out.shape
    assert bool(jnp.all(jnp.isfinite(out)))

    ref = ref_forward(x, logical, G)
    err = float(jnp.max(jnp.abs(out - ref)))
    assert err < 5e-2, f"max |pallas - ref| = {err}"
    print("KERNEL_OK")
</pallas_src>

<mosaic_0001>
module attributes {stable_mosaic.version = 11 : i64} {
  func.func @_fused_ib_kernel(%arg0: i32, %arg1: memref<1x8x8x128xf32, #tpu.memory_space<vmem>>, %arg2: memref<128x128xbf16, #tpu.memory_space<vmem>>, %arg3: memref<1x128xf32, #tpu.memory_space<vmem>>, %arg4: memref<1x128xf32, #tpu.memory_space<vmem>>, %arg5: memref<9x128xf32, #tpu.memory_space<vmem>>, %arg6: memref<1x128xf32, #tpu.memory_space<vmem>>, %arg7: memref<1x128xf32, #tpu.memory_space<vmem>>, %arg8: memref<128x128xbf16, #tpu.memory_space<vmem>>, %arg9: memref<1x128xf32, #tpu.memory_space<vmem>>, %arg10: memref<1x128xf32, #tpu.memory_space<vmem>>, %arg11: memref<128x128xbf16, #tpu.memory_space<vmem>>, %arg12: memref<1x128xf32, #tpu.memory_space<vmem>>, %arg13: memref<1x128xf32, #tpu.memory_space<vmem>>, %arg14: memref<1x8x8x128xf32, #tpu.memory_space<vmem>>, %arg15: memref<10x24x128xf32, #tpu.memory_space<vmem>>) attributes {dimension_semantics = [#tpu.dimension_semantics<parallel>], iteration_bounds = array<i64: 2>, scalar_prefetch = 0 : i64, scratch_operands = 1 : i64, tpu.core_type = #tpu.core_type<tc>, window_params = [{transform_indices = @transform_0, window_bounds = array<i64: 1, 8, 8, 128>}, {pipeline_mode = #tpu.pipeline_mode<synchronous>, transform_indices = @transform_1, window_bounds = array<i64: 128, 128>}, {pipeline_mode = #tpu.pipeline_mode<synchronous>, transform_indices = @transform_2, window_bounds = array<i64: 1, 128>}, {pipeline_mode = #tpu.pipeline_mode<synchronous>, transform_indices = @transform_3, window_bounds = array<i64: 1, 128>}, {pipeline_mode = #tpu.pipeline_mode<synchronous>, transform_indices = @transform_4, window_bounds = array<i64: 9, 128>}, {pipeline_mode = #tpu.pipeline_mode<synchronous>, transform_indices = @transform_5, window_bounds = array<i64: 1, 128>}, {pipeline_mode = #tpu.pipeline_mode<synchronous>, transform_indices = @transform_6, window_bounds = array<i64: 1, 128>}, {pipeline_mode = #tpu.pipeline_mode<synchronous>, transform_indices = @transform_7, window_bounds = array<i64: 128, 128>}, {pipeline_mode = #tpu.pipeline_mode<synchronous>, transform_indices = @transform_8, window_bounds = array<i64: 1, 128>}, {pipeline_mode = #tpu.pipeline_mode<synchronous>, transform_indices = @transform_9, window_bounds = array<i64: 1, 128>}, {pipeline_mode = #tpu.pipeline_mode<synchronous>, transform_indices = @transform_10, window_bounds = array<i64: 128, 128>}, {pipeline_mode = #tpu.pipeline_mode<synchronous>, transform_indices = @transform_11, window_bounds = array<i64: 1, 128>}, {pipeline_mode = #tpu.pipeline_mode<synchronous>, transform_indices = @transform_12, window_bounds = array<i64: 1, 128>}, {transform_indices = @transform_13, window_bounds = array<i64: 1, 8, 8, 128>}]} {
    %c0 = arith.constant 0 : index
    %c0_0 = arith.constant 0 : index
    %c0_1 = arith.constant 0 : index
    %c0_2 = arith.constant 0 : index
    %0 = vector.load %arg1[%c0, %c0_0, %c0_1, %c0_2] : memref<1x8x8x128xf32, #tpu.memory_space<vmem>>, vector<1x8x8x128xf32>
    %1 = vector.shape_cast %0 : vector<1x8x8x128xf32> to vector<64x128xf32>
    %cst = arith.constant 0.000000e+00 : f32
    %2 = vector.broadcast %cst : f32 to vector<64x128xf32>
    %3 = arith.truncf %1 : vector<64x128xf32> to vector<64x128xbf16>
    %c0_3 = arith.constant 0 : index
    %c0_4 = arith.constant 0 : index
    %4 = vector.load %arg2[%c0_3, %c0_4] : memref<128x128xbf16, #tpu.memory_space<vmem>>, vector<128x128xbf16>
    %cst_5 = arith.constant dense<0.000000e+00> : vector<64x128xf32>
    %5 = tpu.matmul %3, %4, %cst_5 {dimension_numbers = #tpu.dot_dimension_numbers<[1], [0], [0], [1], [0, 0, 1, 1], [], []>} : vector<64x128xbf16>, vector<128x128xbf16>, vector<64x128xf32> -> vector<64x128xf32>
    %6 = arith.addf %2, %5 : vector<64x128xf32>
    %c0_6 = arith.constant 0 : index
    %c0_7 = arith.constant 0 : index
    %7 = vector.load %arg3[%c0_6, %c0_7] : memref<1x128xf32, #tpu.memory_space<vmem>>, vector<1x128xf32>
    %8 = vector.broadcast %7 : vector<1x128xf32> to vector<64x128xf32>
    %9 = arith.mulf %6, %8 : vector<64x128xf32>
    %c0_8 = arith.constant 0 : index
    %c0_9 = arith.constant 0 : index
    %10 = vector.load %arg4[%c0_8, %c0_9] : memref<1x128xf32, #tpu.memory_space<vmem>>, vector<1x128xf32>
    %11 = vector.broadcast %10 : vector<1x128xf32> to vector<64x128xf32>
    %12 = arith.addf %9, %11 : vector<64x128xf32>
    %cst_10 = arith.constant 0.000000e+00 : f32
    %cst_11 = arith.constant 6.000000e+00 : f32
    %13 = vector.broadcast %cst_10 : f32 to vector<64x128xf32>
    %14 = arith.maximumf %13, %12 : vector<64x128xf32>
    %15 = vector.broadcast %cst_11 : f32 to vector<64x128xf32>
    %16 = arith.minimumf %15, %14 : vector<64x128xf32>
    %cst_12 = arith.constant 0.000000e+00 : f32
    %17 = vector.broadcast %cst_12 : f32 to vector<10x24x128xf32>
    %c0_13 = arith.constant 0 : index
    %c0_14 = arith.constant 0 : index
    %c0_15 = arith.constant 0 : index
    %18 = vector.load %arg15[%c0_13, %c0_14, %c0_15] : memref<10x24x128xf32, #tpu.memory_space<vmem>>, vector<10x24x128xf32>
    tpu.vector_store %arg15[%c0_13, %c0_14, %c0_15], %17 {strides = array<i32>} : memref<10x24x128xf32, #tpu.memory_space<vmem>>, vector<10x24x128xf32>,
    %19 = vector.shape_cast %16 : vector<64x128xf32> to vector<8x8x128xf32>
    %c1 = arith.constant 1 : index
    %c8 = arith.constant 8 : index
    %c0_16 = arith.constant 0 : index
    %20 = vector.load %arg15[%c1, %c8, %c0_16] : memref<10x24x128xf32, #tpu.memory_space<vmem>>, vector<8x8x128xf32>
    tpu.vector_store %arg15[%c1, %c8, %c0_16], %19 {strides = array<i32>} : memref<10x24x128xf32, #tpu.memory_space<vmem>>, vector<8x8x128xf32>,
    %c0_17 = arith.constant 0 : index
    %c0_18 = arith.constant 0 : index
    %21 = vector.load %arg5[%c0_17, %c0_18] : memref<9x128xf32, #tpu.memory_space<vmem>>, vector<9x128xf32>
    %cst_19 = arith.constant 0.000000e+00 : f32
    %22 = vector.broadcast %cst_19 : f32 to vector<8x8x128xf32>
    %c0_20 = arith.constant 0 : index
    %c7 = arith.constant 7 : index
    %c0_21 = arith.constant 0 : index
    %23 = vector.load %arg15[%c0_20, %c7, %c0_21] : memref<10x24x128xf32, #tpu.memory_space<vmem>>, vector<8x8x128xf32>
    %24 = vector.extract_strided_slice %21 {offsets = [0, 0], sizes = [1, 128], strides = [1, 1]} : vector<9x128xf32> to vector<1x128xf32>
    %25 = vector.shape_cast %24 : vector<1x128xf32> to vector<128xf32>
    %26 = vector.shape_cast %25 : vector<128xf32> to vector<1x1x128xf32>
    %27 = vector.broadcast %26 : vector<1x1x128xf32> to vector<8x8x128xf32>
    %28 = arith.mulf %23, %27 : vector<8x8x128xf32>
    %29 = arith.addf %22, %28 : vector<8x8x128xf32>
    %c0_22 = arith.constant 0 : index
    %c8_23 = arith.constant 8 : index
    %c0_24 = arith.constant 0 : index
    %30 = vector.load %arg15[%c0_22, %c8_23, %c0_24] : memref<10x24x128xf32, #tpu.memory_space<vmem>>, vector<8x8x128xf32>
    %31 = vector.extract_strided_slice %21 {offsets = [1, 0], sizes = [1, 128], strides = [1, 1]} : vector<9x128xf32> to vector<1x128xf32>
    %32 = vector.shape_cast %31 : vector<1x128xf32> to vector<128xf32>
    %33 = vector.shape_cast %32 : vector<128xf32> to vector<1x1x128xf32>
    %34 = vector.broadcast %33 : vector<1x1x128xf32> to vector<8x8x128xf32>
    %35 = arith.mulf %30, %34 : vector<8x8x128xf32>
    %36 = arith.addf %29, %35 : vector<8x8x128xf32>
    %c0_25 = arith.constant 0 : index
    %c9 = arith.constant 9 : index
    %c0_26 = arith.constant 0 : index
    %37 = vector.load %arg15[%c0_25, %c9, %c0_26] : memref<10x24x128xf32, #tpu.memory_space<vmem>>, vector<8x8x128xf32>
    %38 = vector.extract_strided_slice %21 {offsets = [2, 0], sizes = [1, 128], strides = [1, 1]} : vector<9x128xf32> to vector<1x128xf32>
    %39 = vector.shape_cast %38 : vector<1x128xf32> to vector<128xf32>
    %40 = vector.shape_cast %39 : vector<128xf32> to vector<1x1x128xf32>
    %41 = vector.broadcast %40 : vector<1x1x128xf32> to vector<8x8x128xf32>
    %42 = arith.mulf %37, %41 : vector<8x8x128xf32>
    %43 = arith.addf %36, %42 : vector<8x8x128xf32>
    %c1_27 = arith.constant 1 : index
    %c7_28 = arith.constant 7 : index
    %c0_29 = arith.constant 0 : index
    %44 = vector.load %arg15[%c1_27, %c7_28, %c0_29] : memref<10x24x128xf32, #tpu.memory_space<vmem>>, vector<8x8x128xf32>
    %45 = vector.extract_strided_slice %21 {offsets = [3, 0], sizes = [1, 128], strides = [1, 1]} : vector<9x128xf32> to vector<1x128xf32>
    %46 = vector.shape_cast %45 : vector<1x128xf32> to vector<128xf32>
    %47 = vector.shape_cast %46 : vector<128xf32> to vector<1x1x128xf32>
    %48 = vector.broadcast %47 : vector<1x1x128xf32> to vector<8x8x128xf32>
    %49 = arith.mulf %44, %48 : vector<8x8x128xf32>
    %50 = arith.addf %43, %49 : vector<8x8x128xf32>
    %c1_30 = arith.constant 1 : index
    %c8_31 = arith.constant 8 : index
    %c0_32 = arith.constant 0 : index
    %51 = vector.load %arg15[%c1_30, %c8_31, %c0_32] : memref<10x24x128xf32, #tpu.memory_space<vmem>>, vector<8x8x128xf32>
    %52 = vector.extract_strided_slice %21 {offsets = [4, 0], sizes = [1, 128], strides = [1, 1]} : vector<9x128xf32> to vector<1x128xf32>
    %53 = vector.shape_cast %52 : vector<1x128xf32> to vector<128xf32>
    %54 = vector.shape_cast %53 : vector<128xf32> to vector<1x1x128xf32>
    %55 = vector.broadcast %54 : vector<1x1x128xf32> to vector<8x8x128xf32>
    %56 = arith.mulf %51, %55 : vector<8x8x128xf32>
    %57 = arith.addf %50, %56 : vector<8x8x128xf32>
    %c1_33 = arith.constant 1 : index
    %c9_34 = arith.constant 9 : index
    %c0_35 = arith.constant 0 : index
    %58 = vector.load %arg15[%c1_33, %c9_34, %c0_35] : memref<10x24x128xf32, #tpu.memory_space<vmem>>, vector<8x8x128xf32>
    %59 = vector.extract_strided_slice %21 {offsets = [5, 0], sizes = [1, 128], strides = [1, 1]} : vector<9x128xf32> to vector<1x128xf32>
    %60 = vector.shape_cast %59 : vector<1x128xf32> to vector<128xf32>
    %61 = vector.shape_cast %60 : vector<128xf32> to vector<1x1x128xf32>
    %62 = vector.broadcast %61 : vector<1x1x128xf32> to vector<8x8x128xf32>
    %63 = arith.mulf %58, %62 : vector<8x8x128xf32>
    %64 = arith.addf %57, %63 : vector<8x8x128xf32>
    %c2 = arith.constant 2 : index
    %c7_36 = arith.constant 7 : index
    %c0_37 = arith.constant 0 : index
    %65 = vector.load %arg15[%c2, %c7_36, %c0_37] : memref<10x24x128xf32, #tpu.memory_space<vmem>>, vector<8x8x128xf32>
    %66 = vector.extract_strided_slice %21 {offsets = [6, 0], sizes = [1, 128], strides = [1, 1]} : vector<9x128xf32> to vector<1x128xf32>
    %67 = vector.shape_cast %66 : vector<1x128xf32> to vector<128xf32>
    %68 = vector.shape_cast %67 : vector<128xf32> to vector<1x1x128xf32>
    %69 = vector.broadcast %68 : vector<1x1x128xf32> to vector<8x8x128xf32>
    %70 = arith.mulf %65, %69 : vector<8x8x128xf32>
    %71 = arith.addf %64, %70 : vector<8x8x128xf32>
    %c2_38 = arith.constant 2 : index
    %c8_39 = arith.constant 8 : index
    %c0_40 = arith.constant 0 : index
    %72 = vector.load %arg15[%c2_38, %c8_39, %c0_40] : memref<10x24x128xf32, #tpu.memory_space<vmem>>, vector<8x8x128xf32>
    %73 = vector.extract_strided_slice %21 {offsets = [7, 0], sizes = [1, 128], strides = [1, 1]} : vector<9x128xf32> to vector<1x128xf32>
    %74 = vector.shape_cast %73 : vector<1x128xf32> to vector<128xf32>
    %75 = vector.shape_cast %74 : vector<128xf32> to vector<1x1x128xf32>
    %76 = vector.broadcast %75 : vector<1x1x128xf32> to vector<8x8x128xf32>
    %77 = arith.mulf %72, %76 : vector<8x8x128xf32>
    %78 = arith.addf %71, %77 : vector<8x8x128xf32>
    %c2_41 = arith.constant 2 : index
    %c9_42 = arith.constant 9 : index
    %c0_43 = arith.constant 0 : index
    %79 = vector.load %arg15[%c2_41, %c9_42, %c0_43] : memref<10x24x128xf32, #tpu.memory_space<vmem>>, vector<8x8x128xf32>
    %80 = vector.extract_strided_slice %21 {offsets = [8, 0], sizes = [1, 128], strides = [1, 1]} : vector<9x128xf32> to vector<1x128xf32>
    %81 = vector.shape_cast %80 : vector<1x128xf32> to vector<128xf32>
    %82 = vector.shape_cast %81 : vector<128xf32> to vector<1x1x128xf32>
    %83 = vector.broadcast %82 : vector<1x1x128xf32> to vector<8x8x128xf32>
    %84 = arith.mulf %79, %83 : vector<8x8x128xf32>
    %85 = arith.addf %78, %84 : vector<8x8x128xf32>
    %86 = vector.shape_cast %85 : vector<8x8x128xf32> to vector<64x128xf32>
    %c0_44 = arith.constant 0 : index
    %c0_45 = arith.constant 0 : index
    %87 = vector.load %arg6[%c0_44, %c0_45] : memref<1x128xf32, #tpu.memory_space<vmem>>, vector<1x128xf32>
    %88 = vector.broadcast %87 : vector<1x128xf32> to vector<64x128xf32>
    %89 = arith.mulf %86, %88 : vector<64x128xf32>
    %c0_46 = arith.constant 0 : index
    %c0_47 = arith.constant 0 : index
    %90 = vector.load %arg7[%c0_46, %c0_47] : memref<1x128xf32, #tpu.memory_space<vmem>>, vector<1x128xf32>
    %91 = vector.broadcast %90 : vector<1x128xf32> to vector<64x128xf32>
    %92 = arith.addf %89, %91 : vector<64x128xf32>
    %cst_48 = arith.constant 0.000000e+00 : f32
    %cst_49 = arith.constant 6.000000e+00 : f32
    %93 = vector.broadcast %cst_48 : f32 to vector<64x128xf32>
    %94 = arith.maximumf %93, %92 : vector<64x128xf32>
    %95 = vector.broadcast %cst_49 : f32 to vector<64x128xf32>
    %96 = arith.minimumf %95, %94 : vector<64x128xf32>
    %cst_50 = arith.constant 0.000000e+00 : f32
    %97 = vector.broadcast %cst_50 : f32 to vector<64x128xf32>
    %98 = arith.truncf %1 : vector<64x128xf32> to vector<64x128xbf16>
    %c0_51 = arith.constant 0 : index
    %c0_52 = arith.constant 0 : index
    %99 = vector.load %arg11[%c0_51, %c0_52] : memref<128x128xbf16, #tpu.memory_space<vmem>>, vector<128x128xbf16>
    %cst_53 = arith.constant dense<0.000000e+00> : vector<64x128xf32>
    %100 = tpu.matmul %98, %99, %cst_53 {dimension_numbers = #tpu.dot_dimension_numbers<[1], [0], [0], [1], [0, 0, 1, 1], [], []>} : vector<64x128xbf16>, vector<128x128xbf16>, vector<64x128xf32> -> vector<64x128xf32>
    %101 = arith.addf %97, %100 : vector<64x128xf32>
    %c0_54 = arith.constant 0 : index
    %c0_55 = arith.constant 0 : index
    %102 = vector.load %arg12[%c0_54, %c0_55] : memref<1x128xf32, #tpu.memory_space<vmem>>, vector<1x128xf32>
    %103 = vector.broadcast %102 : vector<1x128xf32> to vector<64x128xf32>
    %104 = arith.mulf %101, %103 : vector<64x128xf32>
    %c0_56 = arith.constant 0 : index
    %c0_57 = arith.constant 0 : index
    %105 = vector.load %arg13[%c0_56, %c0_57] : memref<1x128xf32, #tpu.memory_space<vmem>>, vector<1x128xf32>
    %106 = vector.broadcast %105 : vector<1x128xf32> to vector<64x128xf32>
    %107 = arith.addf %104, %106 : vector<64x128xf32>
    %108 = arith.truncf %96 : vector<64x128xf32> to vector<64x128xbf16>
    %c0_58 = arith.constant 0 : index
    %c0_59 = arith.constant 0 : index
    %109 = vector.load %arg8[%c0_58, %c0_59] : memref<128x128xbf16, #tpu.memory_space<vmem>>, vector<128x128xbf16>
    %cst_60 = arith.constant dense<0.000000e+00> : vector<64x128xf32>
    %110 = tpu.matmul %108, %109, %cst_60 {dimension_numbers = #tpu.dot_dimension_numbers<[1], [0], [0], [1], [0, 0, 1, 1], [], []>} : vector<64x128xbf16>, vector<128x128xbf16>, vector<64x128xf32> -> vector<64x128xf32>
    %c0_61 = arith.constant 0 : index
    %c0_62 = arith.constant 0 : index
    %111 = vector.load %arg9[%c0_61, %c0_62] : memref<1x128xf32, #tpu.memory_space<vmem>>, vector<1x128xf32>
    %112 = vector.broadcast %111 : vector<1x128xf32> to vector<64x128xf32>
    %113 = arith.mulf %110, %112 : vector<64x128xf32>
    %c0_63 = arith.constant 0 : index
    %c0_64 = arith.constant 0 : index
    %114 = vector.load %arg10[%c0_63, %c0_64] : memref<1x128xf32, #tpu.memory_space<vmem>>, vector<1x128xf32>
    %115 = vector.broadcast %114 : vector<1x128xf32> to vector<64x128xf32>
    %116 = arith.addf %113, %115 : vector<64x128xf32>
    %117 = arith.addf %116, %107 : vector<64x128xf32>
    %118 = vector.shape_cast %117 : vector<64x128xf32> to vector<1x8x8x128xf32>
    %c0_65 = arith.constant 0 : index
    %c0_66 = arith.constant 0 : index
    %c0_67 = arith.constant 0 : index
    %c0_68 = arith.constant 0 : index
    %119 = vector.load %arg14[%c0_65, %c0_66, %c0_67, %c0_68] : memref<1x8x8x128xf32, #tpu.memory_space<vmem>>, vector<1x8x8x128xf32>
    tpu.vector_store %arg14[%c0_65, %c0_66, %c0_67, %c0_68], %118 {strides = array<i32>} : memref<1x8x8x128xf32, #tpu.memory_space<vmem>>, vector<1x8x8x128xf32>,
    return
  }
  func.func @transform_0(%arg0: i32) -> (i32, i32, i32, i32) {
    %c0_i32 = arith.constant 0 : i32
    %c0_i32_0 = arith.constant 0 : i32
    %c0_i32_1 = arith.constant 0 : i32
    %c0_i32_2 = arith.constant 0 : i32
    return %arg0, %c0_i32, %c0_i32_0, %c0_i32_1 : i32, i32, i32, i32
  }
  func.func @transform_1(%arg0: i32) -> (i32, i32) {
    %c0_i32 = arith.constant 0 : i32
    %c0_i32_0 = arith.constant 0 : i32
    %c0_i32_1 = arith.constant 0 : i32
    return %c0_i32, %c0_i32_0 : i32, i32
  }
  func.func @transform_2(%arg0: i32) -> (i32, i32) {
    %c0_i32 = arith.constant 0 : i32
    %c0_i32_0 = arith.constant 0 : i32
    %c0_i32_1 = arith.constant 0 : i32
    return %c0_i32, %c0_i32_0 : i32, i32
  }
  func.func @transform_3(%arg0: i32) -> (i32, i32) {
    %c0_i32 = arith.constant 0 : i32
    %c0_i32_0 = arith.constant 0 : i32
    %c0_i32_1 = arith.constant 0 : i32
    return %c0_i32, %c0_i32_0 : i32, i32
  }
  func.func @transform_4(%arg0: i32) -> (i32, i32) {
    %c0_i32 = arith.constant 0 : i32
    %c0_i32_0 = arith.constant 0 : i32
    %c0_i32_1 = arith.constant 0 : i32
    return %c0_i32, %c0_i32_0 : i32, i32
  }
  func.func @transform_5(%arg0: i32) -> (i32, i32) {
    %c0_i32 = arith.constant 0 : i32
    %c0_i32_0 = arith.constant 0 : i32
    %c0_i32_1 = arith.constant 0 : i32
    return %c0_i32, %c0_i32_0 : i32, i32
  }
  func.func @transform_6(%arg0: i32) -> (i32, i32) {
    %c0_i32 = arith.constant 0 : i32
    %c0_i32_0 = arith.constant 0 : i32
    %c0_i32_1 = arith.constant 0 : i32
    return %c0_i32, %c0_i32_0 : i32, i32
  }
  func.func @transform_7(%arg0: i32) -> (i32, i32) {
    %c0_i32 = arith.constant 0 : i32
    %c0_i32_0 = arith.constant 0 : i32
    %c0_i32_1 = arith.constant 0 : i32
    return %c0_i32, %c0_i32_0 : i32, i32
  }
  func.func @transform_8(%arg0: i32) -> (i32, i32) {
    %c0_i32 = arith.constant 0 : i32
    %c0_i32_0 = arith.constant 0 : i32
    %c0_i32_1 = arith.constant 0 : i32
    return %c0_i32, %c0_i32_0 : i32, i32
  }
  func.func @transform_9(%arg0: i32) -> (i32, i32) {
    %c0_i32 = arith.constant 0 : i32
    %c0_i32_0 = arith.constant 0 : i32
    %c0_i32_1 = arith.constant 0 : i32
    return %c0_i32, %c0_i32_0 : i32, i32
  }
  func.func @transform_10(%arg0: i32) -> (i32, i32) {
    %c0_i32 = arith.constant 0 : i32
    %c0_i32_0 = arith.constant 0 : i32
    %c0_i32_1 = arith.constant 0 : i32
    return %c0_i32, %c0_i32_0 : i32, i32
  }
  func.func @transform_11(%arg0: i32) -> (i32, i32) {
    %c0_i32 = arith.constant 0 : i32
    %c0_i32_0 = arith.constant 0 : i32
    %c0_i32_1 = arith.constant 0 : i32
    return %c0_i32, %c0_i32_0 : i32, i32
  }
  func.func @transform_12(%arg0: i32) -> (i32, i32) {
    %c0_i32 = arith.constant 0 : i32
    %c0_i32_0 = arith.constant 0 : i32
    %c0_i32_1 = arith.constant 0 : i32
    return %c0_i32, %c0_i32_0 : i32, i32
  }
  func.func @transform_13(%arg0: i32) -> (i32, i32, i32, i32) {
    %c0_i32 = arith.constant 0 : i32
    %c0_i32_0 = arith.constant 0 : i32
    %c0_i32_1 = arith.constant 0 : i32
    %c0_i32_2 = arith.constant 0 : i32
    return %arg0, %c0_i32, %c0_i32_0, %c0_i32_1 : i32, i32, i32, i32
  }
}

module attributes {stable_mosaic.version = 11 : i64} {
  func.func @_fused_ib_kernel(%arg0: i32, %arg1: memref<1x8x8x128xf32, #tpu.memory_space<vmem>>, %arg2: memref<1x8x8x128xf32, #tpu.memory_space<vmem>>, %arg3: memref<128x128xbf16, #tpu.memory_space<vmem>>, %arg4: memref<128x128xbf16, #tpu.memory_space<vmem>>, %arg5: memref<1x128xf32, #tpu.memory_space<vmem>>, %arg6: memref<1x128xf32, #tpu.memory_space<vmem>>, %arg7: memref<9x128xf32, #tpu.memory_space<vmem>>, %arg8: memref<1x128xf32, #tpu.memory_space<vmem>>, %arg9: memref<1x128xf32, #tpu.memory_space<vmem>>, %arg10: memref<128x128xbf16, #tpu.memory_space<vmem>>, %arg11: memref<1x128xf32, #tpu.memory_space<vmem>>, %arg12: memref<1x128xf32, #tpu.memory_space<vmem>>, %arg13: memref<128x128xbf16, #tpu.memory_space<vmem>>, %arg14: memref<128x128xbf16, #tpu.memory_space<vmem>>, %arg15: memref<1x128xf32, #tpu.memory_space<vmem>>, %arg16: memref<1x128xf32, #tpu.memory_space<vmem>>, %arg17: memref<1x8x8x128xf32, #tpu.memory_space<vmem>>, %arg18: memref<10x24x128xf32, #tpu.memory_space<vmem>>) attributes {dimension_semantics = [#tpu.dimension_semantics<parallel>], iteration_bounds = array<i64: 2>, scalar_prefetch = 0 : i64, scratch_operands = 1 : i64, tpu.core_type = #tpu.core_type<tc>, window_params = [{transform_indices = @transform_0, window_bounds = array<i64: 1, 8, 8, 128>}, {transform_indices = @transform_1, window_bounds = array<i64: 1, 8, 8, 128>}, {pipeline_mode = #tpu.pipeline_mode<synchronous>, transform_indices = @transform_2, window_bounds = array<i64: 128, 128>}, {pipeline_mode = #tpu.pipeline_mode<synchronous>, transform_indices = @transform_3, window_bounds = array<i64: 128, 128>}, {pipeline_mode = #tpu.pipeline_mode<synchronous>, transform_indices = @transform_4, window_bounds = array<i64: 1, 128>}, {pipeline_mode = #tpu.pipeline_mode<synchronous>, transform_indices = @transform_5, window_bounds = array<i64: 1, 128>}, {pipeline_mode = #tpu.pipeline_mode<synchronous>, transform_indices = @transform_6, window_bounds = array<i64: 9, 128>}, {pipeline_mode = #tpu.pipeline_mode<synchronous>, transform_indices = @transform_7, window_bounds = array<i64: 1, 128>}, {pipeline_mode = #tpu.pipeline_mode<synchronous>, transform_indices = @transform_8, window_bounds = array<i64: 1, 128>}, {pipeline_mode = #tpu.pipeline_mode<synchronous>, transform_indices = @transform_9, window_bounds = array<i64: 128, 128>}, {pipeline_mode = #tpu.pipeline_mode<synchronous>, transform_indices = @transform_10, window_bounds = array<i64: 1, 128>}, {pipeline_mode = #tpu.pipeline_mode<synchronous>, transform_indices = @transform_11, window_bounds = array<i64: 1, 128>}, {pipeline_mode = #tpu.pipeline_mode<synchronous>, transform_indices = @transform_12, window_bounds = array<i64: 128, 128>}, {pipeline_mode = #tpu.pipeline_mode<synchronous>, transform_indices = @transform_13, window_bounds = array<i64: 128, 128>}, {pipeline_mode = #tpu.pipeline_mode<synchronous>, transform_indices = @transform_14, window_bounds = array<i64: 1, 128>}, {pipeline_mode = #tpu.pipeline_mode<synchronous>, transform_indices = @transform_15, window_bounds = array<i64: 1, 128>}, {transform_indices = @transform_16, window_bounds = array<i64: 1, 8, 8, 128>}]} {
    %c0 = arith.constant 0 : index
    %c0_0 = arith.constant 0 : index
    %c0_1 = arith.constant 0 : index
    %c0_2 = arith.constant 0 : index
    %0 = vector.load %arg1[%c0, %c0_0, %c0_1, %c0_2] : memref<1x8x8x128xf32, #tpu.memory_space<vmem>>, vector<1x8x8x128xf32>
    %1 = vector.shape_cast %0 : vector<1x8x8x128xf32> to vector<64x128xf32>
    %c0_3 = arith.constant 0 : index
    %c0_4 = arith.constant 0 : index
    %c0_5 = arith.constant 0 : index
    %c0_6 = arith.constant 0 : index
    %2 = vector.load %arg2[%c0_3, %c0_4, %c0_5, %c0_6] : memref<1x8x8x128xf32, #tpu.memory_space<vmem>>, vector<1x8x8x128xf32>
    %3 = vector.shape_cast %2 : vector<1x8x8x128xf32> to vector<64x128xf32>
    %cst = arith.constant 0.000000e+00 : f32
    %4 = vector.broadcast %cst : f32 to vector<64x128xf32>
    %5 = arith.truncf %1 : vector<64x128xf32> to vector<64x128xbf16>
    %c0_7 = arith.constant 0 : index
    %c0_8 = arith.constant 0 : index
    %6 = vector.load %arg3[%c0_7, %c0_8] : memref<128x128xbf16, #tpu.memory_space<vmem>>, vector<128x128xbf16>
    %cst_9 = arith.constant dense<0.000000e+00> : vector<64x128xf32>
    %7 = tpu.matmul %5, %6, %cst_9 {dimension_numbers = #tpu.dot_dimension_numbers<[1], [0], [0], [1], [0, 0, 1, 1], [], []>} : vector<64x128xbf16>, vector<128x128xbf16>, vector<64x128xf32> -> vector<64x128xf32>
    %8 = arith.addf %4, %7 : vector<64x128xf32>
    %9 = arith.truncf %3 : vector<64x128xf32> to vector<64x128xbf16>
    %c0_10 = arith.constant 0 : index
    %c0_11 = arith.constant 0 : index
    %10 = vector.load %arg4[%c0_10, %c0_11] : memref<128x128xbf16, #tpu.memory_space<vmem>>, vector<128x128xbf16>
    %cst_12 = arith.constant dense<0.000000e+00> : vector<64x128xf32>
    %11 = tpu.matmul %9, %10, %cst_12 {dimension_numbers = #tpu.dot_dimension_numbers<[1], [0], [0], [1], [0, 0, 1, 1], [], []>} : vector<64x128xbf16>, vector<128x128xbf16>, vector<64x128xf32> -> vector<64x128xf32>
    %12 = arith.addf %8, %11 : vector<64x128xf32>
    %c0_13 = arith.constant 0 : index
    %c0_14 = arith.constant 0 : index
    %13 = vector.load %arg5[%c0_13, %c0_14] : memref<1x128xf32, #tpu.memory_space<vmem>>, vector<1x128xf32>
    %14 = vector.broadcast %13 : vector<1x128xf32> to vector<64x128xf32>
    %15 = arith.mulf %12, %14 : vector<64x128xf32>
    %c0_15 = arith.constant 0 : index
    %c0_16 = arith.constant 0 : index
    %16 = vector.load %arg6[%c0_15, %c0_16] : memref<1x128xf32, #tpu.memory_space<vmem>>, vector<1x128xf32>
    %17 = vector.broadcast %16 : vector<1x128xf32> to vector<64x128xf32>
    %18 = arith.addf %15, %17 : vector<64x128xf32>
    %cst_17 = arith.constant 0.000000e+00 : f32
    %cst_18 = arith.constant 6.000000e+00 : f32
    %19 = vector.broadcast %cst_17 : f32 to vector<64x128xf32>
    %20 = arith.maximumf %19, %18 : vector<64x128xf32>
    %21 = vector.broadcast %cst_18 : f32 to vector<64x128xf32>
    %22 = arith.minimumf %21, %20 : vector<64x128xf32>
    %cst_19 = arith.constant 0.000000e+00 : f32
    %23 = vector.broadcast %cst_19 : f32 to vector<10x24x128xf32>
    %c0_20 = arith.constant 0 : index
    %c0_21 = arith.constant 0 : index
    %c0_22 = arith.constant 0 : index
    %24 = vector.load %arg18[%c0_20, %c0_21, %c0_22] : memref<10x24x128xf32, #tpu.memory_space<vmem>>, vector<10x24x128xf32>
    tpu.vector_store %arg18[%c0_20, %c0_21, %c0_22], %23 {strides = array<i32>} : memref<10x24x128xf32, #tpu.memory_space<vmem>>, vector<10x24x128xf32>,
    %25 = vector.shape_cast %22 : vector<64x128xf32> to vector<8x8x128xf32>
    %c1 = arith.constant 1 : index
    %c8 = arith.constant 8 : index
    %c0_23 = arith.constant 0 : index
    %26 = vector.load %arg18[%c1, %c8, %c0_23] : memref<10x24x128xf32, #tpu.memory_space<vmem>>, vector<8x8x128xf32>
    tpu.vector_store %arg18[%c1, %c8, %c0_23], %25 {strides = array<i32>} : memref<10x24x128xf32, #tpu.memory_space<vmem>>, vector<8x8x128xf32>,
    %c0_24 = arith.constant 0 : index
    %c0_25 = arith.constant 0 : index
    %27 = vector.load %arg7[%c0_24, %c0_25] : memref<9x128xf32, #tpu.memory_space<vmem>>, vector<9x128xf32>
    %cst_26 = arith.constant 0.000000e+00 : f32
    %28 = vector.broadcast %cst_26 : f32 to vector<8x8x128xf32>
    %c0_27 = arith.constant 0 : index
    %c7 = arith.constant 7 : index
    %c0_28 = arith.constant 0 : index
    %29 = vector.load %arg18[%c0_27, %c7, %c0_28] : memref<10x24x128xf32, #tpu.memory_space<vmem>>, vector<8x8x128xf32>
    %30 = vector.extract_strided_slice %27 {offsets = [0, 0], sizes = [1, 128], strides = [1, 1]} : vector<9x128xf32> to vector<1x128xf32>
    %31 = vector.shape_cast %30 : vector<1x128xf32> to vector<128xf32>
    %32 = vector.shape_cast %31 : vector<128xf32> to vector<1x1x128xf32>
    %33 = vector.broadcast %32 : vector<1x1x128xf32> to vector<8x8x128xf32>
    %34 = arith.mulf %29, %33 : vector<8x8x128xf32>
    %35 = arith.addf %28, %34 : vector<8x8x128xf32>
    %c0_29 = arith.constant 0 : index
    %c8_30 = arith.constant 8 : index
    %c0_31 = arith.constant 0 : index
    %36 = vector.load %arg18[%c0_29, %c8_30, %c0_31] : memref<10x24x128xf32, #tpu.memory_space<vmem>>, vector<8x8x128xf32>
    %37 = vector.extract_strided_slice %27 {offsets = [1, 0], sizes = [1, 128], strides = [1, 1]} : vector<9x128xf32> to vector<1x128xf32>
    %38 = vector.shape_cast %37 : vector<1x128xf32> to vector<128xf32>
    %39 = vector.shape_cast %38 : vector<128xf32> to vector<1x1x128xf32>
    %40 = vector.broadcast %39 : vector<1x1x128xf32> to vector<8x8x128xf32>
    %41 = arith.mulf %36, %40 : vector<8x8x128xf32>
    %42 = arith.addf %35, %41 : vector<8x8x128xf32>
    %c0_32 = arith.constant 0 : index
    %c9 = arith.constant 9 : index
    %c0_33 = arith.constant 0 : index
    %43 = vector.load %arg18[%c0_32, %c9, %c0_33] : memref<10x24x128xf32, #tpu.memory_space<vmem>>, vector<8x8x128xf32>
    %44 = vector.extract_strided_slice %27 {offsets = [2, 0], sizes = [1, 128], strides = [1, 1]} : vector<9x128xf32> to vector<1x128xf32>
    %45 = vector.shape_cast %44 : vector<1x128xf32> to vector<128xf32>
    %46 = vector.shape_cast %45 : vector<128xf32> to vector<1x1x128xf32>
    %47 = vector.broadcast %46 : vector<1x1x128xf32> to vector<8x8x128xf32>
    %48 = arith.mulf %43, %47 : vector<8x8x128xf32>
    %49 = arith.addf %42, %48 : vector<8x8x128xf32>
    %c1_34 = arith.constant 1 : index
    %c7_35 = arith.constant 7 : index
    %c0_36 = arith.constant 0 : index
    %50 = vector.load %arg18[%c1_34, %c7_35, %c0_36] : memref<10x24x128xf32, #tpu.memory_space<vmem>>, vector<8x8x128xf32>
    %51 = vector.extract_strided_slice %27 {offsets = [3, 0], sizes = [1, 128], strides = [1, 1]} : vector<9x128xf32> to vector<1x128xf32>
    %52 = vector.shape_cast %51 : vector<1x128xf32> to vector<128xf32>
    %53 = vector.shape_cast %52 : vector<128xf32> to vector<1x1x128xf32>
    %54 = vector.broadcast %53 : vector<1x1x128xf32> to vector<8x8x128xf32>
    %55 = arith.mulf %50, %54 : vector<8x8x128xf32>
    %56 = arith.addf %49, %55 : vector<8x8x128xf32>
    %c1_37 = arith.constant 1 : index
    %c8_38 = arith.constant 8 : index
    %c0_39 = arith.constant 0 : index
    %57 = vector.load %arg18[%c1_37, %c8_38, %c0_39] : memref<10x24x128xf32, #tpu.memory_space<vmem>>, vector<8x8x128xf32>
    %58 = vector.extract_strided_slice %27 {offsets = [4, 0], sizes = [1, 128], strides = [1, 1]} : vector<9x128xf32> to vector<1x128xf32>
    %59 = vector.shape_cast %58 : vector<1x128xf32> to vector<128xf32>
    %60 = vector.shape_cast %59 : vector<128xf32> to vector<1x1x128xf32>
    %61 = vector.broadcast %60 : vector<1x1x128xf32> to vector<8x8x128xf32>
    %62 = arith.mulf %57, %61 : vector<8x8x128xf32>
    %63 = arith.addf %56, %62 : vector<8x8x128xf32>
    %c1_40 = arith.constant 1 : index
    %c9_41 = arith.constant 9 : index
    %c0_42 = arith.constant 0 : index
    %64 = vector.load %arg18[%c1_40, %c9_41, %c0_42] : memref<10x24x128xf32, #tpu.memory_space<vmem>>, vector<8x8x128xf32>
    %65 = vector.extract_strided_slice %27 {offsets = [5, 0], sizes = [1, 128], strides = [1, 1]} : vector<9x128xf32> to vector<1x128xf32>
    %66 = vector.shape_cast %65 : vector<1x128xf32> to vector<128xf32>
    %67 = vector.shape_cast %66 : vector<128xf32> to vector<1x1x128xf32>
    %68 = vector.broadcast %67 : vector<1x1x128xf32> to vector<8x8x128xf32>
    %69 = arith.mulf %64, %68 : vector<8x8x128xf32>
    %70 = arith.addf %63, %69 : vector<8x8x128xf32>
    %c2 = arith.constant 2 : index
    %c7_43 = arith.constant 7 : index
    %c0_44 = arith.constant 0 : index
    %71 = vector.load %arg18[%c2, %c7_43, %c0_44] : memref<10x24x128xf32, #tpu.memory_space<vmem>>, vector<8x8x128xf32>
    %72 = vector.extract_strided_slice %27 {offsets = [6, 0], sizes = [1, 128], strides = [1, 1]} : vector<9x128xf32> to vector<1x128xf32>
    %73 = vector.shape_cast %72 : vector<1x128xf32> to vector<128xf32>
    %74 = vector.shape_cast %73 : vector<128xf32> to vector<1x1x128xf32>
    %75 = vector.broadcast %74 : vector<1x1x128xf32> to vector<8x8x128xf32>
    %76 = arith.mulf %71, %75 : vector<8x8x128xf32>
    %77 = arith.addf %70, %76 : vector<8x8x128xf32>
    %c2_45 = arith.constant 2 : index
    %c8_46 = arith.constant 8 : index
    %c0_47 = arith.constant 0 : index
    %78 = vector.load %arg18[%c2_45, %c8_46, %c0_47] : memref<10x24x128xf32, #tpu.memory_space<vmem>>, vector<8x8x128xf32>
    %79 = vector.extract_strided_slice %27 {offsets = [7, 0], sizes = [1, 128], strides = [1, 1]} : vector<9x128xf32> to vector<1x128xf32>
    %80 = vector.shape_cast %79 : vector<1x128xf32> to vector<128xf32>
    %81 = vector.shape_cast %80 : vector<128xf32> to vector<1x1x128xf32>
    %82 = vector.broadcast %81 : vector<1x1x128xf32> to vector<8x8x128xf32>
    %83 = arith.mulf %78, %82 : vector<8x8x128xf32>
    %84 = arith.addf %77, %83 : vector<8x8x128xf32>
    %c2_48 = arith.constant 2 : index
    %c9_49 = arith.constant 9 : index
    %c0_50 = arith.constant 0 : index
    %85 = vector.load %arg18[%c2_48, %c9_49, %c0_50] : memref<10x24x128xf32, #tpu.memory_space<vmem>>, vector<8x8x128xf32>
    %86 = vector.extract_strided_slice %27 {offsets = [8, 0], sizes = [1, 128], strides = [1, 1]} : vector<9x128xf32> to vector<1x128xf32>
    %87 = vector.shape_cast %86 : vector<1x128xf32> to vector<128xf32>
    %88 = vector.shape_cast %87 : vector<128xf32> to vector<1x1x128xf32>
    %89 = vector.broadcast %88 : vector<1x1x128xf32> to vector<8x8x128xf32>
    %90 = arith.mulf %85, %89 : vector<8x8x128xf32>
    %91 = arith.addf %84, %90 : vector<8x8x128xf32>
    %92 = vector.shape_cast %91 : vector<8x8x128xf32> to vector<64x128xf32>
    %c0_51 = arith.constant 0 : index
    %c0_52 = arith.constant 0 : index
    %93 = vector.load %arg8[%c0_51, %c0_52] : memref<1x128xf32, #tpu.memory_space<vmem>>, vector<1x128xf32>
    %94 = vector.broadcast %93 : vector<1x128xf32> to vector<64x128xf32>
    %95 = arith.mulf %92, %94 : vector<64x128xf32>
    %c0_53 = arith.constant 0 : index
    %c0_54 = arith.constant 0 : index
    %96 = vector.load %arg9[%c0_53, %c0_54] : memref<1x128xf32, #tpu.memory_space<vmem>>, vector<1x128xf32>
    %97 = vector.broadcast %96 : vector<1x128xf32> to vector<64x128xf32>
    %98 = arith.addf %95, %97 : vector<64x128xf32>
    %cst_55 = arith.constant 0.000000e+00 : f32
    %cst_56 = arith.constant 6.000000e+00 : f32
    %99 = vector.broadcast %cst_55 : f32 to vector<64x128xf32>
    %100 = arith.maximumf %99, %98 : vector<64x128xf32>
    %101 = vector.broadcast %cst_56 : f32 to vector<64x128xf32>
    %102 = arith.minimumf %101, %100 : vector<64x128xf32>
    %cst_57 = arith.constant 0.000000e+00 : f32
    %103 = vector.broadcast %cst_57 : f32 to vector<64x128xf32>
    %104 = arith.truncf %1 : vector<64x128xf32> to vector<64x128xbf16>
    %c0_58 = arith.constant 0 : index
    %c0_59 = arith.constant 0 : index
    %105 = vector.load %arg13[%c0_58, %c0_59] : memref<128x128xbf16, #tpu.memory_space<vmem>>, vector<128x128xbf16>
    %cst_60 = arith.constant dense<0.000000e+00> : vector<64x128xf32>
    %106 = tpu.matmul %104, %105, %cst_60 {dimension_numbers = #tpu.dot_dimension_numbers<[1], [0], [0], [1], [0, 0, 1, 1], [], []>} : vector<64x128xbf16>, vector<128x128xbf16>, vector<64x128xf32> -> vector<64x128xf32>
    %107 = arith.addf %103, %106 : vector<64x128xf32>
    %108 = arith.truncf %3 : vector<64x128xf32> to vector<64x128xbf16>
    %c0_61 = arith.constant 0 : index
    %c0_62 = arith.constant 0 : index
    %109 = vector.load %arg14[%c0_61, %c0_62] : memref<128x128xbf16, #tpu.memory_space<vmem>>, vector<128x128xbf16>
    %cst_63 = arith.constant dense<0.000000e+00> : vector<64x128xf32>
    %110 = tpu.matmul %108, %109, %cst_63 {dimension_numbers = #tpu.dot_dimension_numbers<[1], [0], [0], [1], [0, 0, 1, 1], [], []>} : vector<64x128xbf16>, vector<128x128xbf16>, vector<64x128xf32> -> vector<64x128xf32>
    %111 = arith.addf %107, %110 : vector<64x128xf32>
    %c0_64 = arith.constant 0 : index
    %c0_65 = arith.constant 0 : index
    %112 = vector.load %arg15[%c0_64, %c0_65] : memref<1x128xf32, #tpu.memory_space<vmem>>, vector<1x128xf32>
    %113 = vector.broadcast %112 : vector<1x128xf32> to vector<64x128xf32>
    %114 = arith.mulf %111, %113 : vector<64x128xf32>
    %c0_66 = arith.constant 0 : index
    %c0_67 = arith.constant 0 : index
    %115 = vector.load %arg16[%c0_66, %c0_67] : memref<1x128xf32, #tpu.memory_space<vmem>>, vector<1x128xf32>
    %116 = vector.broadcast %115 : vector<1x128xf32> to vector<64x128xf32>
    %117 = arith.addf %114, %116 : vector<64x128xf32>
    %118 = arith.truncf %102 : vector<64x128xf32> to vector<64x128xbf16>
    %c0_68 = arith.constant 0 : index
    %c0_69 = arith.constant 0 : index
    %119 = vector.load %arg10[%c0_68, %c0_69] : memref<128x128xbf16, #tpu.memory_space<vmem>>, vector<128x128xbf16>
    %cst_70 = arith.constant dense<0.000000e+00> : vector<64x128xf32>
    %120 = tpu.matmul %118, %119, %cst_70 {dimension_numbers = #tpu.dot_dimension_numbers<[1], [0], [0], [1], [0, 0, 1, 1], [], []>} : vector<64x128xbf16>, vector<128x128xbf16>, vector<64x128xf32> -> vector<64x128xf32>
    %c0_71 = arith.constant 0 : index
    %c0_72 = arith.constant 0 : index
    %121 = vector.load %arg11[%c0_71, %c0_72] : memref<1x128xf32, #tpu.memory_space<vmem>>, vector<1x128xf32>
    %122 = vector.broadcast %121 : vector<1x128xf32> to vector<64x128xf32>
    %123 = arith.mulf %120, %122 : vector<64x128xf32>
    %c0_73 = arith.constant 0 : index
    %c0_74 = arith.constant 0 : index
    %124 = vector.load %arg12[%c0_73, %c0_74] : memref<1x128xf32, #tpu.memory_space<vmem>>, vector<1x128xf32>
    %125 = vector.broadcast %124 : vector<1x128xf32> to vector<64x128xf32>
    %126 = arith.addf %123, %125 : vector<64x128xf32>
    %127 = arith.addf %126, %117 : vector<64x128xf32>
    %128 = vector.shape_cast %127 : vector<64x128xf32> to vector<1x8x8x128xf32>
    %c0_75 = arith.constant 0 : index
    %c0_76 = arith.constant 0 : index
    %c0_77 = arith.constant 0 : index
    %c0_78 = arith.constant 0 : index
    %129 = vector.load %arg17[%c0_75, %c0_76, %c0_77, %c0_78] : memref<1x8x8x128xf32, #tpu.memory_space<vmem>>, vector<1x8x8x128xf32>
    tpu.vector_store %arg17[%c0_75, %c0_76, %c0_77, %c0_78], %128 {strides = array<i32>} : memref<1x8x8x128xf32, #tpu.memory_space<vmem>>, vector<1x8x8x128xf32>,
    return
  }
  func.func @transform_0(%arg0: i32) -> (i32, i32, i32, i32) {
    %c0_i32 = arith.constant 0 : i32
    %c0_i32_0 = arith.constant 0 : i32
    %c0_i32_1 = arith.constant 0 : i32
    %c0_i32_2 = arith.constant 0 : i32
    return %arg0, %c0_i32, %c0_i32_0, %c0_i32_1 : i32, i32, i32, i32
  }
  func.func @transform_1(%arg0: i32) -> (i32, i32, i32, i32) {
    %c0_i32 = arith.constant 0 : i32
    %c0_i32_0 = arith.constant 0 : i32
    %c0_i32_1 = arith.constant 0 : i32
    %c0_i32_2 = arith.constant 0 : i32
    return %arg0, %c0_i32, %c0_i32_0, %c0_i32_1 : i32, i32, i32, i32
  }
  func.func @transform_2(%arg0: i32) -> (i32, i32) {
    %c0_i32 = arith.constant 0 : i32
    %c0_i32_0 = arith.constant 0 : i32
    %c0_i32_1 = arith.constant 0 : i32
    return %c0_i32, %c0_i32_0 : i32, i32
  }
  func.func @transform_3(%arg0: i32) -> (i32, i32) {
    %c0_i32 = arith.constant 0 : i32
    %c0_i32_0 = arith.constant 0 : i32
    %c0_i32_1 = arith.constant 0 : i32
    return %c0_i32, %c0_i32_0 : i32, i32
  }
  func.func @transform_4(%arg0: i32) -> (i32, i32) {
    %c0_i32 = arith.constant 0 : i32
    %c0_i32_0 = arith.constant 0 : i32
    %c0_i32_1 = arith.constant 0 : i32
    return %c0_i32, %c0_i32_0 : i32, i32
  }
  func.func @transform_5(%arg0: i32) -> (i32, i32) {
    %c0_i32 = arith.constant 0 : i32
    %c0_i32_0 = arith.constant 0 : i32
    %c0_i32_1 = arith.constant 0 : i32
    return %c0_i32, %c0_i32_0 : i32, i32
  }
  func.func @transform_6(%arg0: i32) -> (i32, i32) {
    %c0_i32 = arith.constant 0 : i32
    %c0_i32_0 = arith.constant 0 : i32
    %c0_i32_1 = arith.constant 0 : i32
    return %c0_i32, %c0_i32_0 : i32, i32
  }
  func.func @transform_7(%arg0: i32) -> (i32, i32) {
    %c0_i32 = arith.constant 0 : i32
    %c0_i32_0 = arith.constant 0 : i32
    %c0_i32_1 = arith.constant 0 : i32
    return %c0_i32, %c0_i32_0 : i32, i32
  }
  func.func @transform_8(%arg0: i32) -> (i32, i32) {
    %c0_i32 = arith.constant 0 : i32
    %c0_i32_0 = arith.constant 0 : i32
    %c0_i32_1 = arith.constant 0 : i32
    return %c0_i32, %c0_i32_0 : i32, i32
  }
  func.func @transform_9(%arg0: i32) -> (i32, i32) {
    %c0_i32 = arith.constant 0 : i32
    %c0_i32_0 = arith.constant 0 : i32
    %c0_i32_1 = arith.constant 0 : i32
    return %c0_i32, %c0_i32_0 : i32, i32
  }
  func.func @transform_10(%arg0: i32) -> (i32, i32) {
    %c0_i32 = arith.constant 0 : i32
    %c0_i32_0 = arith.constant 0 : i32
    %c0_i32_1 = arith.constant 0 : i32
    return %c0_i32, %c0_i32_0 : i32, i32
  }
  func.func @transform_11(%arg0: i32) -> (i32, i32) {
    %c0_i32 = arith.constant 0 : i32
    %c0_i32_0 = arith.constant 0 : i32
    %c0_i32_1 = arith.constant 0 : i32
    return %c0_i32, %c0_i32_0 : i32, i32
  }
  func.func @transform_12(%arg0: i32) -> (i32, i32) {
    %c0_i32 = arith.constant 0 : i32
    %c0_i32_0 = arith.constant 0 : i32
    %c0_i32_1 = arith.constant 0 : i32
    return %c0_i32, %c0_i32_0 : i32, i32
  }
  func.func @transform_13(%arg0: i32) -> (i32, i32) {
    %c0_i32 = arith.constant 0 : i32
    %c0_i32_0 = arith.constant 0 : i32
    %c0_i32_1 = arith.constant 0 : i32
    return %c0_i32, %c0_i32_0 : i32, i32
  }
  func.func @transform_14(%arg0: i32) -> (i32, i32) {
    %c0_i32 = arith.constant 0 : i32
    %c0_i32_0 = arith.constant 0 : i32
    %c0_i32_1 = arith.constant 0 : i32
    return %c0_i32, %c0_i32_0 : i32, i32
  }
  func.func @transform_15(%arg0: i32) -> (i32, i32) {
    %c0_i32 = arith.constant 0 : i32
    %c0_i32_0 = arith.constant 0 : i32
    %c0_i32_1 = arith.constant 0 : i32
    return %c0_i32, %c0_i32_0 : i32, i32
  }
  func.func @transform_16(%arg0: i32) -> (i32, i32, i32, i32) {
    %c0_i32 = arith.constant 0 : i32
    %c0_i32_0 = arith.constant 0 : i32
    %c0_i32_1 = arith.constant 0 : i32
    %c0_i32_2 = arith.constant 0 : i32
    return %arg0, %c0_i32, %c0_i32_0, %c0_i32_1 : i32, i32, i32, i32
  }
}

</mosaic_0001>

<bundles_post_ra>
// kernel: feblock3n2s_forward.3
= control target key start
LH: loop header
LB: loop body
LE: loop exit
PB: predicated region body
PF: predicated region fallthrough
CT: control target
= control target key end

     0   :  { %s1644_s25 = smov 0   ;;  %s1973_s0 = inlined_call_operand.vmem [shape: f32[2,8,8,128], index: 0, kind: input, shape index: {}]   ;;  %s1974_s1 = inlined_call_operand.vmem [shape: bf16[128,128], index: 1, kind: input, shape index: {}]   ;;  %s1975_s2 = inlined_call_operand.vmem [shape: f32[1,128], index: 2, kind: input, shape index: {}]   ;;  %s1976_s3 = inlined_call_operand.vmem [shape: f32[1,128], index: 3, kind: input, shape index: {}]   ;;  %s1977_s4 = inlined_call_operand.vmem [shape: f32[9,128], index: 4, kind: input, shape index: {}]   ;;  %s1978_s5 = inlined_call_operand.vmem [shape: f32[1,128], index: 5, kind: input, shape index: {}]   ;;  %s1979_s6 = inlined_call_operand.vmem [shape: f32[1,128], index: 6, kind: input, shape index: {}]   ;;  %s1980_s7 = inlined_call_operand.vmem [shape: bf16[128,128], index: 7, kind: input, shape index: {}]   ;;  %s1981_s8 = inlined_call_operand.vmem [shape: f32[1,128], index: 8, kind: input, shape index: {}]   ;;  %s1982_s9 = inlined_call_operand.vmem [shape: f32[1,128], index: 9, kind: input, shape index: {}]   ;;  %s1983_s10 = inlined_call_operand.vmem [shape: bf16[128,128], index: 10, kind: input, shape index: {}]   ;;  %s1984_s11 = inlined_call_operand.vmem [shape: f32[1,128], index: 11, kind: input, shape index: {}]   ;;  %s1985_s12 = inlined_call_operand.vmem [shape: f32[1,128], index: 12, kind: input, shape index: {}]   ;;  %s1986_s13 = inlined_call_operand.vmem [shape: f32[2,8,8,128], index: 13, kind: output, shape index: {}]  }
   0x1 LB: > { %s1362_s26 = sadd.s32 4294967295, %s1571_s25   ;;  %p1366_p0 = scmp.ge.s32.totalorder %s1571_s25, 1  ;;  %s1571_s25 = sphi %s1644_s25, %s23_s25  }
   0x2   : > { %p387_p1 = scmp.lt.s32.totalorder %s1571_s25, 3 }
   0x4   : > { %p388_p2 = pnand %p1366_p0, %p387_p1 }
   0x5   : > { %p431_p3 = scmp.lt.s32.totalorder (!%p388_p2), %s1362_s26, 1 }
   0x6   : > { %391 = sbr.rel (%p388_p2) target bundleno = 513 (0x201), region = 72 }
   0xb   : > { %v1541_v0 = vld [vmem:[%s1974_s1 + $0x38] sm:$0xff]   ;;  %v1542_v1 = vld [vmem:[%s1974_s1 + $0x30] sm:$0xff]   ;;  %s1988_s26 = smov (!%p431_p3, %s1362_s26), 1  ;;  %v1543_v2 = vld [vmem:[%s1974_s1 + $0x28] sm:$0xff]   ;;  %v1573_v25 = vmov 0.0   ;;  %v678_v37 = vlaneseq }
   0xc   : > { %1444 = vmatprep.subr.bf16.mxu0 %v1541_v0  ;;  %s1406_s16 = sshll.u32 %s1988_s26, 6  ;;  %v1544_v3 = vld [vmem:[%s1974_s1 + $0x20] sm:$0xff]   ;;  %v1545_v7 = vld [vmem:[%s1974_s1 + $0x18] sm:$0xff]   ;;  %v1550_v9 = vld [vmem:[%s1983_s10 + $0x30] sm:$0xff]   ;;  %629 = vst [vmem:[#allocation2] sm:$0xff] %v1573_v25 }
   0xd   : > { %1445 = vmatpush3.bf16.msra.mxu0 %v1541_v0  ;;  %s1669_s19 = scalar_lea.vmem %s1973_s0, %s1406_s16  ;;  %v1549_v8 = vld [vmem:[%s1983_s10 + $0x38] sm:$0xff]   ;;  %v1551_v10 = vld [vmem:[%s1983_s10 + $0x28] sm:$0xff]   ;;  %v1546_v11 = vld [vmem:[%s1974_s1 + $0x10] sm:$0xff]   ;;  %630 = vst [vmem:[#allocation2 + $0x8] sm:$0xff] %v1573_v25  ;;  %v679_v38 = vshrl.u32 %v678_v37, 7  ;;  %s1960_s30 = scalar_lea.vmem %s1986_s13, %s1406_s16 }
   0xe   : > { %1446 = vmatprep.subr.bf16.mxu0 %v1542_v1  ;;  %v442_v4 = vld [vmem:[%s1669_s19] sm:$0xff]  ;;  %v443_v5 = vld [vmem:[%s1669_s19 + $0x8] sm:$0xff]  ;;  %1468 = vmatprep.subr.bf16.mxu1 %v1549_v8  ;;  %v444_v14 = vld [vmem:[%s1669_s19 + $0x10] sm:$0xff]  ;;  %631 = vst [vmem:[#allocation2 + $0x10] sm:$0xff] %v1573_v25 }
   0xf   : > { %v450_v6 = vpack.c.bf16 %v443_v5, %v442_v4  ;;  %1469 = vmatpush3.bf16.msra.mxu1 %v1549_v8  ;;  %v1547_v12 = vld [vmem:[%s1974_s1 + $0x8] sm:$0xff]   ;;  %v1548_v13 = vld [vmem:[%s1974_s1] sm:$0xff]   ;;  %v445_v15 = vld [vmem:[%s1669_s19 + $0x18] sm:$0xff]  ;;  %632 = vst [vmem:[#allocation2 + $0x18] sm:$0xff] %v1573_v25  ;;  %v680_v39 = vsub.s32 0, %v679_v38  ;;  %v708_v41 = vsub.s32 1, %v679_v38 }
  0x10   : > { %1470 = vmatprep.subr.bf16.mxu1 %v1550_v9  ;;  %v446_v16 = vld [vmem:[%s1669_s19 + $0x20] sm:$0xff]  ;;  %v447_v17 = vld [vmem:[%s1669_s19 + $0x28] sm:$0xff]  ;;  %v451_v18 = vpack.c.bf16 %v445_v15, %v444_v14  ;;  %v448_v20 = vld [vmem:[%s1669_s19 + $0x30] sm:$0xff]  ;;  %634 = vst [vmem:[#allocation2 + $0x28] sm:$0xff] %v1573_v25  ;;  %v736_v46 = vsub.s32 2, %v679_v38  ;;  %v792_v53 = vsub.s32 4, %v679_v38 }
  0x11   : > { %1447 = vmatpush3.bf16.msra.mxu0 %v1542_v1  ;;  %1460 = vmatprep.mubr.bf16.mxu0 %v450_v6  ;;  %v452_v19 = vpack.c.bf16 %v447_v17, %v446_v16  ;;  %v449_v21 = vld [vmem:[%s1669_s19 + $0x38] sm:$0xff]  ;;  %v1552_v23 = vld [vmem:[%s1983_s10 + $0x20] sm:$0xff]   ;;  %635 = vst [vmem:[#allocation2 + $0x30] sm:$0xff] %v1573_v25  ;;  %637 = vst [vmem:[#allocation2 + $0x40] sm:$0xff] %v1573_v25  ;;  %v877_v58 = vsub.s32 7, %v679_v38  ;;  %v764_v0 = vsub.s32 3, %v679_v38 }
  0x12   : > { %1448 = vmatprep.subr.bf16.mxu0 %v1543_v2  ;;  %1484 = vmatprep.mubr.bf16.mxu1 %v450_v6  ;;  %v453_v22 = vpack.c.bf16 %v449_v21, %v448_v20  ;;  %v1553_v24 = vld [vmem:[%s1983_s10 + $0x18] sm:$0xff]   ;;  %638 = vst [vmem:[#allocation2 + $0x48] sm:$0xff] %v1573_v25  ;;  %640 = vst [vmem:[#allocation2 + $0x58] sm:$0xff] %v1573_v25  ;;  %v1554_v26 = vld [vmem:[%s1983_s10 + $0x10] sm:$0xff]   ;;  %v820_v1 = vsub.s32 5, %v679_v38 }
  0x13   : > { %1471 = vmatpush3.bf16.msra.mxu1 %v1550_v9  ;;  %641 = vst [vmem:[#allocation2 + $0x60] sm:$0xff] %v1573_v25  ;;  %643 = vst [vmem:[#allocation2 + $0x70] sm:$0xff] %v1573_v25  ;;  %v1555_v27 = vld [vmem:[%s1983_s10 + $0x8] sm:$0xff]   ;;  %v1556_v28 = vld [vmem:[%s1983_s10] sm:$0xff]  }
  0x14   : > { %1472 = vmatprep.subr.bf16.mxu1 %v1551_v10  ;;  %644 = vst [vmem:[#allocation2 + $0x78] sm:$0xff] %v1573_v25  ;;  %646 = vst [vmem:[#allocation2 + $0x88] sm:$0xff] %v1573_v25  ;;  %v1557_v29 = vld [vmem:[%s1980_s7 + $0x38] sm:$0xff]   ;;  %v1558_v30 = vld [vmem:[%s1980_s7 + $0x30] sm:$0xff]  }
  0x15   : > { %1449 = vmatpush3.bf16.msra.mxu0 %v1543_v2  ;;  %647 = vst [vmem:[#allocation2 + $0x90] sm:$0xff] %v1573_v25  ;;  %649 = vst [vmem:[#allocation2 + $0xa0] sm:$0xff] %v1573_v25  ;;  %v1559_v31 = vld [vmem:[%s1980_s7 + $0x28] sm:$0xff]   ;;  %v1560_v32 = vld [vmem:[%s1980_s7 + $0x20] sm:$0xff]   ;;  %v849_v2 = vsub.s32 6, %v679_v38 }
  0x16   : > { %1450 = vmatprep.subr.bf16.mxu0 %v1544_v3  ;;  %650 = vst [vmem:[#allocation2 + $0xa8] sm:$0xff] %v1573_v25  ;;  %652 = vst [vmem:[#allocation2 + $0xb8] sm:$0xff] %v1573_v25  ;;  %v1561_v33 = vld [vmem:[%s1980_s7 + $0x18] sm:$0xff]   ;;  %v1562_v34 = vld [vmem:[%s1980_s7 + $0x10] sm:$0xff]  }
  0x17   : > { %1473 = vmatpush3.bf16.msra.mxu1 %v1551_v10  ;;  %653 = vst [vmem:[#allocation2 + $0xc0] sm:$0xff] %v1573_v25  ;;  %655 = vst [vmem:[#allocation2 + $0xd0] sm:$0xff] %v1573_v25  ;;  %v1563_v35 = vld [vmem:[%s1980_s7 + $0x8] sm:$0xff]   ;;  %v1564_v36 = vld [vmem:[%s1980_s7] sm:$0xff]  }
  0x18   : > { %1474 = vmatprep.subr.bf16.mxu1 %v1552_v23  ;;  %656 = vst [vmem:[#allocation2 + $0xd8] sm:$0xff] %v1573_v25  ;;  %657 = vst [vmem:[#allocation2 + $0xe0] sm:$0xff] %v1573_v25  ;;  %v1745_v40 = vld [vmem:[%s1975_s2] ss:$0 sm:$0xff]  ;;  %v670_v48 = vld [vmem:[#allocation2 + $0x7] sm:$0xff] }
  0x19   : > { %1451 = vmatpush3.bf16.msra.mxu0 %v1544_v3  ;;  %658 = vst [vmem:[#allocation2 + $0xe8] sm:$0xff] %v1573_v25  ;;  %v668_v42 = vld [vmem:[%s1977_s4] sm:$0xff]  ;;  %v726_v62 = vld [vmem:[#allocation2 + $0x9] sm:$0xff] }
  0x1a   : > { %1452 = vmatprep.subr.bf16.mxu0 %v1545_v7  ;;  %v1753_v44 = vld [vmem:[%s1976_s3] ss:$0 sm:$0xff]  ;;  %v1755_v45 = vrot.slane %v668_v42, %v680_v39  ;;  %v1758_v50 = vrot.slane %v668_v42, %v708_v41  ;;  %v1764_v57 = vrot.slane %v668_v42, %v736_v46  ;;  %v1771_v10 = vrot.slane %v668_v42, %v792_v53 }
  0x1b   : > { %1475 = vmatpush3.bf16.msra.mxu1 %v1552_v23  ;;  %v1777_v17 = vrot.slane %v668_v42, %v764_v0 }
  0x1c   : > { %1476 = vmatprep.subr.bf16.mxu1 %v1553_v24  ;;  %v682_v55 = vmul.f32 %v1755_v45, %v670_v48  ;;  %v710_v56 = vmul.f32 0.0, %v1758_v50  ;;  %v738_v9 = vmul.f32 %v1764_v57, %v726_v62 }
  0x1d   : > { %1453 = vmatpush3.bf16.msra.mxu0 %v1545_v7 }
  0x1e   : > { %1454 = vmatprep.subr.bf16.mxu0 %v1546_v11  ;;  %v718_v8 = vadd.f32 %v710_v56, %v682_v55 }
  0x1f   : > { %1477 = vmatpush3.bf16.msra.mxu1 %v1553_v24 }
  0x20   : > { %1478 = vmatprep.subr.bf16.mxu1 %v1554_v26  ;;  %v746_v25 = vadd.f32 %v738_v9, %v718_v8 }
  0x21   : > { %1455 = vmatpush3.bf16.msra.mxu0 %v1546_v11  ;;  %v1773_v11 = vrot.slane %v668_v42, %v877_v58 }
  0x22   : > { %1456 = vmatprep.subr.bf16.mxu0 %v1547_v12 }
  0x23   : > { %1479 = vmatpush3.bf16.msra.mxu1 %v1554_v26 }
  0x24   : > { %1480 = vmatprep.subr.bf16.mxu1 %v1555_v27 }
  0x25   : > { %1457 = vmatpush3.bf16.msra.mxu0 %v1547_v12 }
  0x26   : > { %1458 = vmatprep.subr.bf16.mxu0 %v1548_v13 }
  0x27   : > { %1481 = vmatpush3.bf16.msra.mxu1 %v1555_v27 }
  0x28   : > { %1482 = vmatprep.subr.bf16.mxu1 %v1556_v28 }
  0x29   : > { %1459 = vmatpush3.bf16.msra.mxu0 %v1548_v13 }
  0x2a   : > { %1492 = vmatprep.subr.bf16.mxu0 %v1557_v29 }
  0x2b   : > { %1483 = vmatpush3.bf16.msra.mxu1 %v1556_v28 }
  0x2c   : > { %1461 = vmatmul.mubr.bf16.vlgmr.msra.gmra.mxu0 %v451_v18  ;;  %1516 = vmatprep.subr.bf16.mxu1 %v1557_v29 }
  0x2d   : > { %1464 = vmatprep.mubr.bf16.mxu0 %v452_v19  ;;  %1493 = vmatpush3.bf16.msra.mxu0 %v1557_v29 }
  0x2e   : > { %1485 = vmatmul.mubr.bf16.vlgmr.msra.gmra.mxu1 %v451_v18  ;;  %1494 = vmatprep.subr.bf16.mxu0 %v1558_v30  ;;  %v1779_v18 = vrot.slane %v668_v42, %v820_v1 }
  0x2f   : > { %1524 = vmatpush3.bf16.msra.mxu1 %v1557_v29  ;;  %1488 = vmatprep.mubr.bf16.mxu1 %v452_v19  ;;  %v1781_v19 = vrot.slane %v668_v42, %v849_v2 }
  0x30   : > { %1517 = vmatprep.subr.bf16.mxu1 %v1558_v30 }
  0x31   : > { %1495 = vmatpush3.bf16.msra.mxu0 %v1558_v30 }
  0x32   : > { %1496 = vmatprep.subr.bf16.mxu0 %v1559_v31 }
  0x33   : > { %1525 = vmatpush3.bf16.msra.mxu1 %v1558_v30 }
  0x34   : > { %1465 = vmatmul.mubr.bf16.gmra.mxu0 %v453_v22  ;;  %1518 = vmatprep.subr.bf16.mxu1 %v1559_v31 }
  0x35   : > { %1497 = vmatpush3.bf16.msra.mxu0 %v1559_v31 }
  0x36   : > { %1498 = vmatprep.subr.bf16.mxu0 %v1560_v32  ;;  %1489 = vmatmul.mubr.bf16.gmra.mxu1 %v453_v22 }
  0x37   : > { %1526 = vmatpush3.bf16.msra.mxu1 %v1559_v31 }
  0x38   : > { %1519 = vmatprep.subr.bf16.mxu1 %v1560_v32 }
  0x39   : > { %1499 = vmatpush3.bf16.msra.mxu0 %v1560_v32 }
  0x3a   : > { %1500 = vmatprep.subr.bf16.mxu0 %v1561_v33 }
  0x3b   : > { %1527 = vmatpush3.bf16.msra.mxu1 %v1560_v32 }
  0x3c   : > { %1520 = vmatprep.subr.bf16.mxu1 %v1561_v33 }
  0x3d   : > { %1501 = vmatpush3.bf16.msra.mxu0 %v1561_v33 }
  0x3e   : > { %1502 = vmatprep.subr.bf16.mxu0 %v1562_v34 }
  0x3f   : > { %1528 = vmatpush3.bf16.msra.mxu1 %v1561_v33 }
  0x40   : > { %1521 = vmatprep.subr.bf16.mxu1 %v1562_v34 }
  0x41   : > { %1503 = vmatpush3.bf16.msra.mxu0 %v1562_v34 }
  0x42   : > { %1504 = vmatprep.subr.bf16.mxu0 %v1563_v35 }
  0x43   : > { %1529 = vmatpush3.bf16.msra.mxu1 %v1562_v34 }
  0x44   : > { %1522 = vmatprep.subr.bf16.mxu1 %v1563_v35 }
  0x45   : > { %1505 = vmatpush3.bf16.msra.mxu0 %v1563_v35 }
  0x46   : > { %1506 = vmatprep.subr.bf16.mxu0 %v1564_v36 }
  0x47   : > { %1530 = vmatpush3.bf16.msra.mxu1 %v1563_v35 }
  0x48   : > { %1523 = vmatprep.subr.bf16.mxu1 %v1564_v36 }
  0x49   : > { %1507 = vmatpush3.bf16.msra.mxu0 %v1564_v36 }
  0x4b   : > { %1531 = vmatpush3.bf16.msra.mxu1 %v1564_v36 }
  0xec   : > { %v1462_v43 = vpop.f32.mrf.mxu0 }
  0xed   : > { %v592_v47 = vmul.f32 %v1462_v43, %v1745_v40  ;;  %v1809_v43 = vld [vmem:[%s1977_s4 + $0x8] ss:$0 sm:$0xff] }
  0xee   : > { %v552_v49 = vpop.f32.mrf.mxu0 }
  0xef   : > { %v607_v51 = vadd.f32 %v1753_v44, %v592_v47  ;;  %v590_v52 = vmul.f32 %v1745_v40, %v552_v49 }
  0xf0   : > { %v1463_v54 = vpop.f32.mrf.mxu0 }
  0xf1   : > { %v615_v59 = vmax.f32 %v607_v51, 0.0  ;;  %v605_v60 = vadd.f32 %v1753_v44, %v590_v52  ;;  %v593_v61 = vmul.f32 %v1463_v54, %v1745_v40 }
  0xf2   : > { %v555_v63 = vpop.f32.mrf.mxu0 }
  0xf3   : > { %v623_v3 = vmin.f32 %v615_v59, 6.0  ;;  %v613_v4 = vmax.f32 %v605_v60, 0.0  ;;  %v608_v5 = vadd.f32 %v1753_v44, %v593_v61  ;;  %v591_v6 = vmul.f32 %v1745_v40, %v555_v63 }
  0xf4   : > { %v1466_v7 = vpop.f32.mrf.mxu0 }
  0xf5   : > { %662 = vst [vmem:[#allocation2 + $0x50] sm:$0xff] %v623_v3  ;;  %v621_v12 = vmin.f32 %v613_v4, 6.0  ;;  %v616_v13 = vmax.f32 %v608_v5, 0.0  ;;  %v606_v14 = vadd.f32 %v1753_v44, %v591_v6  ;;  %v596_v15 = vmul.f32 %v1466_v7, %v1745_v40 }
  0xf6   : > { %v568_v16 = vpop.f32.mrf.mxu0  ;;  %v1786_v26 = vmul.f32 %v1773_v11, %v623_v3  ;;  %v713_v27 = vmul.f32 %v1758_v50, %v623_v3  ;;  %v1790_v28 = vmul.f32 %v1771_v10, %v623_v3 }
  0xf7   : > { %660 = vst [vmem:[#allocation2 + $0x20] sm:$0xff] %v621_v12  ;;  %v624_v20 = vmin.f32 %v616_v13, 6.0  ;;  %v614_v21 = vmax.f32 %v606_v14, 0.0  ;;  %v611_v22 = vadd.f32 %v1753_v44, %v596_v15  ;;  %v594_v23 = vmul.f32 %v1745_v40, %v568_v16 }
  0xf8   : > { %v1467_v24 = vpop.f32.mrf.mxu0  ;;  %v711_v34 = vmul.f32 %v1758_v50, %v621_v12  ;;  %v794_v35 = vmul.f32 %v1771_v10, %v621_v12 }
  0xf9   : > { %663 = vst [vmem:[#allocation2 + $0x68] sm:$0xff] %v624_v20  ;;  %v622_v29 = vmin.f32 %v614_v21, 6.0  ;;  %v619_v30 = vmax.f32 %v611_v22, 0.0  ;;  %v609_v31 = vadd.f32 %v1753_v44, %v594_v23  ;;  %v597_v32 = vmul.f32 %v1467_v24, %v1745_v40 }
  0xfa   : > { %v571_v33 = vpop.f32.mrf.mxu0  ;;  %v1797_v36 = vmul.f32 %v1771_v10, %v624_v20  ;;  %v1800_v37 = vmul.f32 %v1773_v11, %v624_v20  ;;  %v714_v52 = vmul.f32 %v1758_v50, %v624_v20 }
  0xfb   : > { %661 = vst [vmem:[#allocation2 + $0x38] sm:$0xff] %v622_v29  ;;  %v1802_v38 = vmin.f32 %v619_v30, 6.0  ;;  %v617_v39 = vmax.f32 %v609_v31, 0.0  ;;  %v612_v41 = vadd.f32 %v1753_v44, %v597_v32  ;;  %v595_v42 = vmul.f32 %v1745_v40, %v571_v33 }
  0xfc   : > { %v795_v46 = vmul.f32 %v1771_v10, %v622_v29  ;;  %v840_v47 = vld [vmem:[#allocation2 + $0x4f] sm:$0xff]  ;;  %v1813_v48 = vmul.f32 %v1773_v11, %v622_v29  ;;  %v712_v51 = vmul.f32 %v1758_v50, %v622_v29 }
  0xfd   : > { %v896_v49 = vld [vmem:[#allocation2 + $0x51] sm:$0xff]  ;;  %666 = vst [vmem:[#allocation2 + $0xb0] sm:$0xff] %v1802_v38  ;;  %v1818_v53 = vmin.f32 %v617_v39, 6.0  ;;  %v620_v40 = vmax.f32 %v612_v41, 0.0  ;;  %v610_v54 = vadd.f32 %v1753_v44, %v595_v42  ;;  %v1822_v55 = vmul.f32 %v1781_v19, %v840_v47 }
  0xfe   : > { %v671_v56 = vld [vmem:[#allocation2 + $0x1f] sm:$0xff]  ;;  %v1825_v59 = vmul.f32 %v1809_v43, %v896_v49  ;;  %v685_v60 = vmul.f32 %v840_v47, %v1755_v45  ;;  %v741_v61 = vmul.f32 %v896_v49, %v1764_v57  ;;  %v768_v62 = vmul.f32 %v840_v47, %v1777_v17 }
  0xff   : > { %v727_v58 = vld [vmem:[#allocation2 + $0x21] sm:$0xff]  ;;  %664 = vst [vmem:[#allocation2 + $0x80] sm:$0xff] %v1818_v53  ;;  %v1831_v63 = vmin.f32 %v620_v40, 6.0  ;;  %v618_v0 = vmax.f32 %v610_v54, 0.0  ;;  %v683_v44 = vmul.f32 %v1755_v45, %v671_v56  ;;  %v766_v2 = vmul.f32 %v1777_v17, %v671_v56 }
 0x100   : > { %v739_v1 = vmul.f32 %v1764_v57, %v727_v58  ;;  %v822_v3 = vmul.f32 %v1779_v18, %v727_v58  ;;  %v721_v4 = vadd.f32 %v713_v27, %v685_v60  ;;  %v757_v5 = vld [vmem:[#allocation2 + $0x67] sm:$0xff]  ;;  %v1838_v7 = vmul.f32 %v896_v49, %v1779_v18 }
 0x101   : > { %v813_v6 = vld [vmem:[#allocation2 + $0x69] sm:$0xff]  ;;  %667 = vst [vmem:[#allocation2 + $0xc8] sm:$0xff] %v1831_v63  ;;  %v1841_v8 = vmin.f32 %v618_v0, 6.0  ;;  %v719_v9 = vadd.f32 %v711_v34, %v683_v44  ;;  %v769_v12 = vmul.f32 %v1777_v17, %v757_v5  ;;  %v774_v15 = vadd.f32 %v766_v2, %v746_v25 }
 0x102   : > { %v825_v13 = vmul.f32 %v1779_v18, %v813_v6  ;;  %v755_v14 = vld [vmem:[#allocation2 + $0x37] sm:$0xff]  ;;  %v749_v20 = vadd.f32 %v741_v61, %v721_v4  ;;  %v1846_v21 = vmul.f32 %v1781_v19, %v757_v5  ;;  %v882_v22 = vmul.f32 %v1773_v11, %v1818_v53 }
 0x103   : > { %v811_v16 = vld [vmem:[#allocation2 + $0x39] sm:$0xff]  ;;  %665 = vst [vmem:[#allocation2 + $0x98] sm:$0xff] %v1841_v8  ;;  %v747_v23 = vadd.f32 %v739_v1, %v719_v9  ;;  %v767_v24 = vmul.f32 %v1777_v17, %v755_v14  ;;  %v851_v29 = vmul.f32 %v1781_v19, %v755_v14  ;;  %v802_v30 = vadd.f32 %v794_v35, %v774_v15 }
 0x104   : > { %v823_v27 = vmul.f32 %v1779_v18, %v811_v16  ;;  %v907_v25 = vmul.f32 %v1809_v43, %v811_v16  ;;  %v684_v31 = vmul.f32 %v755_v14, %v1755_v45  ;;  %v740_v32 = vmul.f32 %v811_v16, %v1764_v57  ;;  %v1875_v15 = vld [vmem:[%s1978_s5] ss:$0 sm:$0xff] }
 0x105   : > { %v775_v33 = vadd.f32 %v767_v24, %v747_v23  ;;  %v777_v34 = vadd.f32 %v769_v12, %v749_v20  ;;  %v1858_v39 = vmul.f32 %v1809_v43, %v813_v6  ;;  %v686_v41 = vmul.f32 %v757_v5, %v1755_v45 }
 0x106   : > { %v830_v42 = vadd.f32 %v822_v3, %v802_v30  ;;  %v720_v47 = vadd.f32 %v712_v51, %v684_v31  ;;  %v842_v49 = vld [vmem:[#allocation2 + $0x7f] sm:$0xff]  ;;  %v715_v35 = vmul.f32 %v1758_v50, %v1818_v53  ;;  %v742_v54 = vmul.f32 %v813_v6, %v1764_v57 }
 0x107   : > { %v898_v40 = vld [vmem:[#allocation2 + $0x81] sm:$0xff]  ;;  %v803_v56 = vadd.f32 %v795_v46, %v775_v33  ;;  %v805_v58 = vadd.f32 %v1797_v36, %v777_v34  ;;  %v854_v60 = vmul.f32 %v1781_v19, %v842_v49  ;;  %v687_v1 = vmul.f32 %v842_v49, %v1755_v45  ;;  %v844_v33 = vld [vmem:[#allocation2 + $0xaf] sm:$0xff] }
 0x108   : > { %v910_v61 = vmul.f32 %v1809_v43, %v898_v40  ;;  %v859_v0 = vadd.f32 %v851_v29, %v830_v42  ;;  %v748_v44 = vadd.f32 %v740_v32, %v720_v47  ;;  %v722_v2 = vadd.f32 %v714_v52, %v686_v41 }
 0x109   : > { %v831_v51 = vadd.f32 %v823_v27, %v803_v56  ;;  %v833_v3 = vadd.f32 %v825_v13, %v805_v58  ;;  %v743_v4 = vmul.f32 %v898_v40, %v1764_v57  ;;  %v770_v5 = vmul.f32 %v842_v49, %v1777_v17 }
 0x10a   : > { %v887_v6 = vadd.f32 %v1813_v48, %v859_v0  ;;  %v776_v46 = vadd.f32 %v768_v62, %v748_v44  ;;  %v723_v9 = vadd.f32 %v715_v35, %v687_v1  ;;  %v750_v36 = vadd.f32 %v742_v54, %v722_v2  ;;  %v759_v12 = vld [vmem:[#allocation2 + $0x97] sm:$0xff] }
 0x10b   : > { %v860_v14 = vadd.f32 %v1822_v55, %v831_v51  ;;  %v862_v52 = vadd.f32 %v854_v60, %v833_v3  ;;  %v771_v13 = vmul.f32 %v1777_v17, %v759_v12  ;;  %v798_v16 = vmul.f32 %v1771_v10, %v1818_v53  ;;  %v815_v24 = vld [vmem:[#allocation2 + $0x99] sm:$0xff]  ;;  %v900_v0 = vld [vmem:[#allocation2 + $0xb1] sm:$0xff] }
 0x10c   : > { %v915_v20 = vadd.f32 %v907_v25, %v887_v6  ;;  %v804_v48 = vadd.f32 %v1790_v28, %v776_v46  ;;  %v751_v62 = vadd.f32 %v743_v4, %v723_v9  ;;  %v778_v23 = vadd.f32 %v770_v5, %v750_v36  ;;  %v1885_v55 = vld [vmem:[%s1979_s6] ss:$0 sm:$0xff] }
 0x10d   : > { %v888_v27 = vadd.f32 %v1786_v26, %v860_v14  ;;  %v890_v29 = vadd.f32 %v882_v22, %v862_v52  ;;  %v799_v30 = vmul.f32 %v1771_v10, %v1841_v8  ;;  %v826_v31 = vmul.f32 %v898_v40, %v1779_v18 }
 0x10e   : > { %v930_v53 = vmul.f32 %v1875_v15, %v915_v20  ;;  %v832_v28 = vadd.f32 %v1838_v7, %v804_v48  ;;  %v779_v25 = vadd.f32 %v771_v13, %v751_v62  ;;  %v806_v32 = vadd.f32 %v798_v16, %v778_v23 }
 0x10f   : > { %v916_v26 = vadd.f32 %v1825_v59, %v888_v27  ;;  %v918_v34 = vadd.f32 %v910_v61, %v890_v29  ;;  %v827_v41 = vmul.f32 %v1779_v18, %v815_v24  ;;  %v855_v42 = vmul.f32 %v1781_v19, %v759_v12  ;;  %v761_v27 = vld [vmem:[#allocation2 + $0xc7] sm:$0xff] }
 0x110   : > { %v945_v22 = vadd.f32 %v1885_v55, %v930_v53  ;;  %v861_v47 = vadd.f32 %v1846_v21, %v832_v28  ;;  %v807_v49 = vadd.f32 %v799_v30, %v779_v25  ;;  %v834_v40 = vadd.f32 %v826_v31, %v806_v32 }
 0x111   : > { %v931_v35 = vmul.f32 %v1875_v15, %v916_v26  ;;  %v933_v7 = vmul.f32 %v1875_v15, %v918_v34  ;;  %v856_v54 = vmul.f32 %v1781_v19, %v844_v33  ;;  %v883_v59 = vmul.f32 %v1773_v11, %v1841_v8  ;;  %v846_v34 = vld [vmem:[#allocation2 + $0xdf] sm:$0xff] }
 0x112   : > { %v953_v56 = vmax.f32 %v945_v22, 0.0  ;;  %v889_v58 = vadd.f32 %v1800_v37, %v861_v47  ;;  %v835_v60 = vadd.f32 %v827_v41, %v807_v49  ;;  %v863_v61 = vadd.f32 %v855_v42, %v834_v40  ;;  %v817_v47 = vld [vmem:[#allocation2 + $0xc9] sm:$0xff] }
 0x113   : > { %v946_v44 = vadd.f32 %v1885_v55, %v931_v35  ;;  %v948_v21 = vadd.f32 %v1885_v55, %v933_v7  ;;  %v884_v1 = vmul.f32 %v1773_v11, %v1802_v38  ;;  %v911_v4 = vmul.f32 %v1809_v43, %v815_v24 }
 0x114   : > { %v917_v2 = vadd.f32 %v1858_v39, %v889_v58  ;;  %v864_v51 = vadd.f32 %v856_v54, %v835_v60  ;;  %v891_v3 = vadd.f32 %v883_v59, %v863_v61  ;;  %v961_v6 = vmin.f32 %v953_v56, 6.0 }
 0x115   : > { %v954_v5 = vmax.f32 %v946_v44, 0.0  ;;  %v912_v37 = vmul.f32 %v1809_v43, %v900_v0  ;;  %v688_v46 = vmul.f32 %v759_v12, %v1755_v45  ;;  %v689_v52 = vmul.f32 %v844_v33, %v1755_v45  ;;  %v902_v44 = vld [vmem:[#allocation2 + $0xe1] sm:$0xff] }
 0x116   : > { %v932_v9 = vmul.f32 %v1875_v15, %v917_v2  ;;  %v892_v36 = vadd.f32 %v884_v1, %v864_v51  ;;  %v919_v14 = vadd.f32 %v911_v4, %v891_v3  ;;  %v956_v16 = vmax.f32 %v948_v21, 0.0 }
 0x117   : > { %v962_v13 = vmin.f32 %v954_v5, 6.0  ;;  %v716_v39 = vmul.f32 %v1758_v50, %v1841_v8  ;;  %v717_v20 = vmul.f32 %v1758_v50, %v1802_v38  ;;  %v744_v12 = vmul.f32 %v815_v24, %v1764_v57 }
 0x118   : > { %v947_v48 = vadd.f32 %v1885_v55, %v932_v9  ;;  %v920_v62 = vadd.f32 %v912_v37, %v892_v36  ;;  %v934_v23 = vmul.f32 %v1875_v15, %v919_v14  ;;  %v745_v45 = vmul.f32 %v900_v0, %v1764_v57 }
 0x119   : > { %v1128_v29 = vpack.c.bf16 %v962_v13, %v961_v6  ;;  %v724_v30 = vadd.f32 %v716_v39, %v688_v46  ;;  %v725_v31 = vadd.f32 %v717_v20, %v689_v52  ;;  %v772_v32 = vmul.f32 %v844_v33, %v1777_v17  ;;  %v1486_v39 = vpop.f32.mrf.mxu1 }
 0x11a   : > { %v955_v53 = vmax.f32 %v947_v48, 0.0  ;;  %v935_v28 = vmul.f32 %v1875_v15, %v920_v62  ;;  %v949_v8 = vadd.f32 %v1885_v55, %v934_v23  ;;  %v773_v26 = vmul.f32 %v1777_v17, %v761_v27 }
 0x11b   : > { %1508 = vmatprep.mubr.bf16.mxu0 %v1128_v29  ;;  %v752_v50 = vadd.f32 %v744_v12, %v724_v30  ;;  %v753_v25 = vadd.f32 %v745_v45, %v725_v31  ;;  %v964_v41 = vmin.f32 %v956_v16, 6.0  ;;  %v800_v40 = vmul.f32 %v1771_v10, %v1802_v38  ;;  %v1067_v20 = vpop.f32.mrf.mxu1 }
 0x11c   : > { %v963_v24 = vmin.f32 %v955_v53, 6.0  ;;  %v950_v42 = vadd.f32 %v1885_v55, %v935_v28  ;;  %v957_v22 = vmax.f32 %v949_v8, 0.0  ;;  %v801_v35 = vmul.f32 %v1771_v10, %v1831_v63 }
 0x11d   : > { %v780_v57 = vadd.f32 %v772_v32, %v752_v50  ;;  %v781_v49 = vadd.f32 %v773_v26, %v753_v25  ;;  %v858_v33 = vmul.f32 %v1781_v19, %v846_v34  ;;  %v828_v56 = vmul.f32 %v900_v0, %v1779_v18  ;;  %v1487_v48 = vpop.f32.mrf.mxu1 }
 0x11e   : > { %v1129_v7 = vpack.c.bf16 %v964_v41, %v963_v24  ;;  %v958_v54 = vmax.f32 %v950_v42, 0.0  ;;  %v829_v58 = vmul.f32 %v1779_v18, %v817_v47  ;;  %v965_v60 = vmin.f32 %v957_v22, 6.0 }
 0x11f   : > { %v808_v17 = vadd.f32 %v800_v40, %v780_v57  ;;  %v809_v59 = vadd.f32 %v801_v35, %v781_v49  ;;  %v857_v38 = vmul.f32 %v1781_v19, %v761_v27  ;;  %v886_v10 = vmul.f32 0.0, %v1773_v11  ;;  %v1403_v27 = vld [vmem:[%s1982_s9] ss:$0 sm:$0xff]  ;;  %v1070_v30 = vpop.f32.mrf.mxu1 }
 0x120   : > { %1509 = vmatmul.mubr.bf16.vlgmr.msra.gmra.mxu0 %v1129_v7  ;;  %v966_v61 = vmin.f32 %v958_v54, 6.0  ;;  %v885_v4 = vmul.f32 %v1773_v11, %v1831_v63  ;;  %v914_v0 = vmul.f32 %v1809_v43, %v902_v44  ;;  %v913_v6 = vmul.f32 %v1809_v43, %v817_v47  ;;  %v1392_v43 = vld [vmem:[%s1984_s11] ss:$0 sm:$0xff] }
 0x121   : > { %v836_v21 = vadd.f32 %v828_v56, %v808_v17  ;;  %v837_v1 = vadd.f32 %v829_v58, %v809_v59  ;;  %v1107_v62 = vmul.f32 %v1486_v39, %v1392_v43  ;;  %v1105_v23 = vmul.f32 %v1392_v43, %v1067_v20  ;;  %v1490_v26 = vpop.f32.mrf.mxu1 }
 0x122   : > { %v1130_v2 = vpack.c.bf16 %v966_v61, %v965_v60  ;;  %v1108_v53 = vmul.f32 %v1487_v48, %v1392_v43  ;;  %v1106_v32 = vmul.f32 %v1392_v43, %v1070_v30  ;;  %v1111_v56 = vmul.f32 %v1490_v26, %v1392_v43 }
 0x123   : > { %v865_v51 = vadd.f32 %v857_v38, %v836_v21  ;;  %v866_v3 = vadd.f32 %v858_v33, %v837_v1  ;;  %v1083_v35 = vpop.f32.mrf.mxu1 }
 0x124   : > { %1512 = vmatprep.mubr.bf16.mxu1 %v1130_v2  ;;  %v1109_v58 = vmul.f32 %v1392_v43, %v1083_v35 }
 0x125   : > { %v893_v18 = vadd.f32 %v885_v4, %v865_v51  ;;  %v894_v5 = vadd.f32 %v886_v10, %v866_v3  ;;  %v1491_v17 = vpop.f32.mrf.mxu1 }
 0x126   : > { %v1112_v1 = vmul.f32 %v1491_v17, %v1392_v43 }
 0x127   : > { %v921_v37 = vadd.f32 %v913_v6, %v893_v18  ;;  %v922_v46 = vadd.f32 %v914_v0, %v894_v5  ;;  %v1086_v59 = vpop.f32.mrf.mxu1 }
 0x128   : > { %v1110_v3 = vmul.f32 %v1392_v43, %v1086_v59 }
 0x129   : > { %v936_v9 = vmul.f32 %v1875_v15, %v921_v37  ;;  %v937_v19 = vmul.f32 %v1875_v15, %v922_v46  ;;  %v1402_v15 = vld [vmem:[%s1981_s8] ss:$0 sm:$0xff] }
 0x12b   : > { %v951_v36 = vadd.f32 %v1885_v55, %v936_v9  ;;  %v952_v14 = vadd.f32 %v1885_v55, %v937_v19  ;;  %v1393_v55 = vld [vmem:[%s1985_s12] ss:$0 sm:$0xff] }
 0x12c   : > { %v1122_v45 = vadd.f32 %v1393_v55, %v1107_v62  ;;  %v1120_v50 = vadd.f32 %v1393_v55, %v1105_v23  ;;  %v1123_v22 = vadd.f32 %v1393_v55, %v1108_v53  ;;  %v1121_v40 = vadd.f32 %v1393_v55, %v1106_v32 }
 0x12d   : > { %v959_v52 = vmax.f32 %v951_v36, 0.0  ;;  %v960_v13 = vmax.f32 %v952_v14, 0.0  ;;  %v1126_v21 = vadd.f32 %v1393_v55, %v1111_v56  ;;  %v1124_v2 = vadd.f32 %v1393_v55, %v1109_v58 }
 0x12e   : > { %v1127_v6 = vadd.f32 %v1393_v55, %v1112_v1  ;;  %v1125_v19 = vadd.f32 %v1393_v55, %v1110_v3 }
 0x12f   : > { %v967_v11 = vmin.f32 %v959_v52, 6.0  ;;  %v968_v63 = vmin.f32 %v960_v13, 6.0 }
 0x131   : > { %v1131_v16 = vpack.c.bf16 %v968_v63, %v967_v11 }
 0x133   : > { %1513 = vmatmul.mubr.bf16.vlgmr.msra.gmra.mxu1 %v1131_v16 }
 0x1e0   : > { %v1510_v12 = vpop.f32.mrf.mxu0 }
 0x1e1   : > { %v1270_v29 = vmul.f32 %v1510_v12, %v1402_v15 }
 0x1e2   : > { %v1230_v31 = vpop.f32.mrf.mxu0 }
 0x1e3   : > { %v1285_v28 = vadd.f32 %v1403_v27, %v1270_v29  ;;  %v1268_v8 = vmul.f32 %v1402_v15, %v1230_v31 }
 0x1e4   : > { %v1511_v25 = vpop.f32.mrf.mxu0 }
 0x1e5   : > { %v1293_v34 = vadd.f32 %v1285_v28, %v1122_v45  ;;  %v1283_v24 = vadd.f32 %v1403_v27, %v1268_v8  ;;  %v1271_v41 = vmul.f32 %v1511_v25, %v1402_v15 }
 0x1e6   : > { %v1233_v42 = vpop.f32.mrf.mxu0 }
 0x1e7   : > { %1301 = vst [vmem:[%s1960_s30 + $0x10] sm:$0xff] %v1293_v34  ;;  %v1291_v47 = vadd.f32 %v1283_v24, %v1120_v50  ;;  %v1286_v57 = vadd.f32 %v1403_v27, %v1271_v41  ;;  %v1269_v49 = vmul.f32 %v1402_v15, %v1233_v42 }
 0x1e9   : > { %1299 = vst [vmem:[%s1960_s30] sm:$0xff] %v1291_v47  ;;  %v1294_v7 = vadd.f32 %v1286_v57, %v1123_v22  ;;  %v1284_v54 = vadd.f32 %v1403_v27, %v1269_v49 }
 0x1eb   : > { %1302 = vst [vmem:[%s1960_s30 + $0x18] sm:$0xff] %v1294_v7  ;;  %v1292_v33 = vadd.f32 %v1284_v54, %v1121_v40 }
 0x1ed   : > { %1300 = vst [vmem:[%s1960_s30 + $0x8] sm:$0xff] %v1292_v33 }
 0x1f3   : > { %v1514_v60 = vpop.f32.mrf.mxu1 }
 0x1f4   : > { %v1274_v61 = vmul.f32 %v1514_v60, %v1402_v15 }
 0x1f5   : > { %v1246_v44 = vpop.f32.mrf.mxu1 }
 0x1f6   : > { %v1289_v38 = vadd.f32 %v1403_v27, %v1274_v61  ;;  %v1272_v10 = vmul.f32 %v1402_v15, %v1246_v44 }
 0x1f7   : > { %v1515_v51 = vpop.f32.mrf.mxu1 }
 0x1f8   : > { %v1297_v4 = vadd.f32 %v1289_v38, %v1126_v21  ;;  %v1287_v0 = vadd.f32 %v1403_v27, %v1272_v10  ;;  %v1275_v18 = vmul.f32 %v1515_v51, %v1402_v15 }
 0x1f9   : > { %v1249_v5 = vpop.f32.mrf.mxu1 }
 0x1fa   : > { %1305 = vst [vmem:[%s1960_s30 + $0x30] sm:$0xff] %v1297_v4  ;;  %v1295_v37 = vadd.f32 %v1287_v0, %v1124_v2  ;;  %v1290_v46 = vadd.f32 %v1403_v27, %v1275_v18  ;;  %v1273_v9 = vmul.f32 %v1402_v15, %v1249_v5 }
 0x1fc   : > { %1303 = vst [vmem:[%s1960_s30 + $0x20] sm:$0xff] %v1295_v37  ;;  %v1298_v36 = vadd.f32 %v1290_v46, %v1127_v6  ;;  %v1288_v14 = vadd.f32 %v1403_v27, %v1273_v9 }
 0x1fe   : > { %1306 = vst [vmem:[%s1960_s30 + $0x38] sm:$0xff] %v1298_v36  ;;  %v1296_v52 = vadd.f32 %v1288_v14, %v1125_v19 }
 0x200   : > { %1304 = vst [vmem:[%s1960_s30 + $0x28] sm:$0xff] %v1296_v52 }
 0x201 PF: > { %s23_s25 = sadd.s32 1, %s1571_s25  }
 0x202   : > { %p20_p4 = scmp.ge.s32.totalorder %s23_s25, 4  }
 0x204   :  { %22 = sbr.rel (!%p20_p4) target bundleno = 1 (0x1), region = 104 }

// kernel: feblock3n2s_forward.4
= control target key start
LH: loop header
LB: loop body
LE: loop exit
PB: predicated region body
PF: predicated region fallthrough
CT: control target
= control target key end

     0   :  { %s2149_s21 = smov 0   ;;  %s2567_s0 = inlined_call_operand.vmem [shape: f32[2,8,8,128], index: 0, kind: input, shape index: {}]   ;;  %s2568_s1 = inlined_call_operand.vmem [shape: f32[2,8,8,128], index: 1, kind: input, shape index: {}]   ;;  %s2569_s2 = inlined_call_operand.vmem [shape: bf16[128,128], index: 2, kind: input, shape index: {}]   ;;  %s2570_s3 = inlined_call_operand.vmem [shape: bf16[128,128], index: 3, kind: input, shape index: {}]   ;;  %s2571_s4 = inlined_call_operand.vmem [shape: f32[1,128], index: 4, kind: input, shape index: {}]   ;;  %s2572_s5 = inlined_call_operand.vmem [shape: f32[1,128], index: 5, kind: input, shape index: {}]   ;;  %s2573_s6 = inlined_call_operand.vmem [shape: f32[9,128], index: 6, kind: input, shape index: {}]   ;;  %s2574_s7 = inlined_call_operand.vmem [shape: f32[1,128], index: 7, kind: input, shape index: {}]   ;;  %s2575_s8 = inlined_call_operand.vmem [shape: f32[1,128], index: 8, kind: input, shape index: {}]   ;;  %s2576_s9 = inlined_call_operand.vmem [shape: bf16[128,128], index: 9, kind: input, shape index: {}]   ;;  %s2577_s10 = inlined_call_operand.vmem [shape: f32[1,128], index: 10, kind: input, shape index: {}]   ;;  %s2578_s11 = inlined_call_operand.vmem [shape: f32[1,128], index: 11, kind: input, shape index: {}]   ;;  %s2579_s12 = inlined_call_operand.vmem [shape: bf16[128,128], index: 12, kind: input, shape index: {}]   ;;  %s2580_s13 = inlined_call_operand.vmem [shape: bf16[128,128], index: 13, kind: input, shape index: {}]   ;;  %s2581_s14 = inlined_call_operand.vmem [shape: f32[1,128], index: 14, kind: input, shape index: {}]   ;;  %s2582_s15 = inlined_call_operand.vmem [shape: f32[1,128], index: 15, kind: input, shape index: {}]   ;;  %s2583_s16 = inlined_call_operand.vmem [shape: f32[2,8,8,128], index: 16, kind: output, shape index: {}]  }
   0x1   :  { %2584 = sst [smem:[#allocation3_spill]] %s2567_s0 }
   0x2 LB: > { %s1745_s22 = sadd.s32 4294967295, %s2061_s21   ;;  %p1749_p0 = scmp.ge.s32.totalorder %s2061_s21, 1  ;;  %s2061_s21 = sphi %s2149_s21, %s26_s21  }
   0x3   : > { %p472_p1 = scmp.lt.s32.totalorder %s2061_s21, 3 }
   0x5   : > { %p473_p2 = pnand %p1749_p0, %p472_p1 }
   0x6   : > { %p527_p3 = scmp.lt.s32.totalorder (!%p473_p2), %s1745_s22, 1  ;;  %s2585_s20 = sld [smem:[#allocation3_spill]] (!%p473_p2) }
   0x7   : > { %476 = sbr.rel (%p473_p2) target bundleno = 517 (0x205), region = 84 }
   0xc   : > { %v2015_v0 = vld [vmem:[%s2570_s3 + $0x38] sm:$0xff]   ;;  %v2017_v2 = vld [vmem:[%s2570_s3 + $0x30] sm:$0xff]   ;;  %v2019_v4 = vld [vmem:[%s2570_s3 + $0x28] sm:$0xff]   ;;  %s2587_s22 = smov (!%p527_p3, %s1745_s22), 1  ;;  %v2063_v51 = vmov 0.0  }
   0xd   : > { %v2016_v1 = vld [vmem:[%s2569_s2 + $0x38] sm:$0xff]   ;;  %1870 = vmatprep.subr.bf16.mxu0 %v2015_v0  ;;  %v2018_v3 = vld [vmem:[%s2569_s2 + $0x30] sm:$0xff]   ;;  %v2020_v5 = vld [vmem:[%s2569_s2 + $0x28] sm:$0xff]   ;;  %s2181_s26 = sshll.u32 %s2587_s22, 6  ;;  %871 = vst [vmem:[#allocation2] sm:$0xff] %v2063_v51 }
   0xe   : > { %1894 = vmatprep.subr.bf16.mxu1 %v2016_v1  ;;  %1871 = vmatpush3.bf16.msra.mxu0 %v2015_v0  ;;  %v2021_v6 = vld [vmem:[%s2570_s3 + $0x20] sm:$0xff]   ;;  %v2023_v8 = vld [vmem:[%s2570_s3 + $0x18] sm:$0xff]   ;;  %s2193_s18 = scalar_lea.vmem %s2568_s1, %s2181_s26  ;;  %s2199_s23 = scalar_lea.vmem %s2585_s20, %s2181_s26  ;;  %v2025_v10 = vld [vmem:[%s2570_s3 + $0x10] sm:$0xff]   ;;  %872 = vst [vmem:[#allocation2 + $0x8] sm:$0xff] %v2063_v51 }
   0xf   : > { %1895 = vmatpush3.bf16.msra.mxu1 %v2016_v1  ;;  %1872 = vmatprep.subr.bf16.mxu0 %v2017_v2  ;;  %v2022_v7 = vld [vmem:[%s2569_s2 + $0x20] sm:$0xff]   ;;  %v2024_v9 = vld [vmem:[%s2569_s2 + $0x18] sm:$0xff]   ;;  %v552_v12 = vld [vmem:[%s2193_s18 + $0x8] sm:$0xff]  ;;  %873 = vst [vmem:[#allocation2 + $0x10] sm:$0xff] %v2063_v51  ;;  %v920_v1 = vlaneseq  ;;  %s2554_s0 = scalar_lea.vmem %s2583_s16, %s2181_s26 }
  0x10   : > { %1896 = vmatprep.subr.bf16.mxu1 %v2018_v3  ;;  %v551_v11 = vld [vmem:[%s2193_s18] sm:$0xff]  ;;  %v2026_v14 = vld [vmem:[%s2569_s2 + $0x10] sm:$0xff]   ;;  %v544_v16 = vld [vmem:[%s2199_s23 + $0x8] sm:$0xff]  ;;  %874 = vst [vmem:[#allocation2 + $0x18] sm:$0xff] %v2063_v51 }
  0x11   : > { %v543_v13 = vld [vmem:[%s2199_s23] sm:$0xff]  ;;  %v579_v15 = vpack.c.bf16 %v552_v12, %v551_v11  ;;  %v2027_v18 = vld [vmem:[%s2570_s3 + $0x8] sm:$0xff]   ;;  %v553_v22 = vld [vmem:[%s2193_s18 + $0x10] sm:$0xff]  ;;  %876 = vst [vmem:[#allocation2 + $0x28] sm:$0xff] %v2063_v51 }
  0x12   : > { %1873 = vmatpush3.bf16.msra.mxu0 %v2017_v2  ;;  %v559_v17 = vpack.c.bf16 %v544_v16, %v543_v13  ;;  %v2028_v19 = vld [vmem:[%s2569_s2 + $0x8] sm:$0xff]   ;;  %v2029_v20 = vld [vmem:[%s2570_s3] sm:$0xff]   ;;  %v554_v23 = vld [vmem:[%s2193_s18 + $0x18] sm:$0xff]  ;;  %877 = vst [vmem:[#allocation2 + $0x30] sm:$0xff] %v2063_v51  ;;  %v921_v2 = vshrl.u32 %v920_v1, 7 }
  0x13   : > { %1897 = vmatpush3.bf16.msra.mxu1 %v2018_v3  ;;  %1874 = vmatprep.subr.bf16.mxu0 %v2019_v4  ;;  %v2030_v21 = vld [vmem:[%s2569_s2] sm:$0xff]   ;;  %v545_v24 = vld [vmem:[%s2199_s23 + $0x10] sm:$0xff]  ;;  %v546_v25 = vld [vmem:[%s2199_s23 + $0x18] sm:$0xff]  ;;  %v2237_v32 = vpack.c.bf16 %v554_v23, %v553_v22  ;;  %879 = vst [vmem:[#allocation2 + $0x40] sm:$0xff] %v2063_v51 }
  0x14   : > { %1898 = vmatprep.subr.bf16.mxu1 %v2020_v5  ;;  %1886 = vmatprep.mubr.bf16.mxu0 %v579_v15  ;;  %v555_v26 = vld [vmem:[%s2193_s18 + $0x20] sm:$0xff]  ;;  %v556_v27 = vld [vmem:[%s2193_s18 + $0x28] sm:$0xff]  ;;  %v2031_v28 = vld [vmem:[%s2580_s13 + $0x38] sm:$0xff]   ;;  %v2239_v33 = vpack.c.bf16 %v546_v25, %v545_v24  ;;  %880 = vst [vmem:[#allocation2 + $0x48] sm:$0xff] %v2063_v51  ;;  %v922_v3 = vsub.s32 0, %v921_v2  ;;  %v1119_v24 = vsub.s32 7, %v921_v2 }
  0x15   : > { %1910 = vmatprep.mubr.bf16.mxu1 %v559_v17  ;;  %v547_v29 = vld [vmem:[%s2199_s23 + $0x20] sm:$0xff]  ;;  %v548_v30 = vld [vmem:[%s2199_s23 + $0x28] sm:$0xff]  ;;  %v2032_v31 = vld [vmem:[%s2579_s12 + $0x38] sm:$0xff]   ;;  %v2241_v34 = vpack.c.bf16 %v556_v27, %v555_v26  ;;  %882 = vst [vmem:[#allocation2 + $0x58] sm:$0xff] %v2063_v51 }
  0x16   : > { %1875 = vmatpush3.bf16.msra.mxu0 %v2019_v4  ;;  %v2033_v35 = vld [vmem:[%s2580_s13 + $0x30] sm:$0xff]   ;;  %v2246_v36 = vpack.c.bf16 %v548_v30, %v547_v29  ;;  %v558_v39 = vld [vmem:[%s2193_s18 + $0x38] sm:$0xff]  ;;  %v2035_v42 = vld [vmem:[%s2580_s13 + $0x28] sm:$0xff]   ;;  %883 = vst [vmem:[#allocation2 + $0x60] sm:$0xff] %v2063_v51  ;;  %v950_v4 = vsub.s32 1, %v921_v2 }
  0x17   : > { %1899 = vmatpush3.bf16.msra.mxu1 %v2020_v5  ;;  %1876 = vmatprep.subr.bf16.mxu0 %v2021_v6  ;;  %v2034_v37 = vld [vmem:[%s2579_s12 + $0x30] sm:$0xff]   ;;  %v550_v41 = vld [vmem:[%s2199_s23 + $0x38] sm:$0xff]  ;;  %v2036_v45 = vld [vmem:[%s2579_s12 + $0x28] sm:$0xff]   ;;  %885 = vst [vmem:[#allocation2 + $0x70] sm:$0xff] %v2063_v51 }
  0x18   : > { %1900 = vmatprep.subr.bf16.mxu1 %v2022_v7  ;;  %v557_v38 = vld [vmem:[%s2193_s18 + $0x30] sm:$0xff]  ;;  %v2037_v46 = vld [vmem:[%s2580_s13 + $0x20] sm:$0xff]   ;;  %v2039_v48 = vld [vmem:[%s2580_s13 + $0x18] sm:$0xff]   ;;  %886 = vst [vmem:[#allocation2 + $0x78] sm:$0xff] %v2063_v51 }
  0x19   : > { %v549_v40 = vld [vmem:[%s2199_s23 + $0x30] sm:$0xff]  ;;  %v2262_v43 = vpack.c.bf16 %v558_v39, %v557_v38  ;;  %v2038_v47 = vld [vmem:[%s2579_s12 + $0x20] sm:$0xff]   ;;  %v2040_v49 = vld [vmem:[%s2579_s12 + $0x18] sm:$0xff]   ;;  %888 = vst [vmem:[#allocation2 + $0x88] sm:$0xff] %v2063_v51 }
  0x1a   : > { %1877 = vmatpush3.bf16.msra.mxu0 %v2021_v6  ;;  %v2264_v44 = vpack.c.bf16 %v550_v41, %v549_v40  ;;  %v2041_v50 = vld [vmem:[%s2580_s13 + $0x10] sm:$0xff]   ;;  %889 = vst [vmem:[#allocation2 + $0x90] sm:$0xff] %v2063_v51  ;;  %891 = vst [vmem:[#allocation2 + $0xa0] sm:$0xff] %v2063_v51  ;;  %v2043_v53 = vld [vmem:[%s2580_s13 + $0x8] sm:$0xff]  }
  0x1b   : > { %1901 = vmatpush3.bf16.msra.mxu1 %v2022_v7  ;;  %1878 = vmatprep.subr.bf16.mxu0 %v2023_v8  ;;  %892 = vst [vmem:[#allocation2 + $0xa8] sm:$0xff] %v2063_v51  ;;  %894 = vst [vmem:[#allocation2 + $0xb8] sm:$0xff] %v2063_v51  ;;  %v2042_v52 = vld [vmem:[%s2579_s12 + $0x10] sm:$0xff]   ;;  %v2044_v54 = vld [vmem:[%s2579_s12 + $0x8] sm:$0xff]  }
  0x1c   : > { %1902 = vmatprep.subr.bf16.mxu1 %v2024_v9  ;;  %895 = vst [vmem:[#allocation2 + $0xc0] sm:$0xff] %v2063_v51  ;;  %897 = vst [vmem:[#allocation2 + $0xd0] sm:$0xff] %v2063_v51  ;;  %v2045_v55 = vld [vmem:[%s2580_s13] sm:$0xff]   ;;  %v2047_v57 = vld [vmem:[%s2576_s9 + $0x38] sm:$0xff]  }
  0x1d   : > { %898 = vst [vmem:[#allocation2 + $0xd8] sm:$0xff] %v2063_v51  ;;  %899 = vst [vmem:[#allocation2 + $0xe0] sm:$0xff] %v2063_v51  ;;  %v2046_v56 = vld [vmem:[%s2579_s12] sm:$0xff]   ;;  %v2048_v58 = vld [vmem:[%s2576_s9 + $0x30] sm:$0xff]  }
  0x1e   : > { %1879 = vmatpush3.bf16.msra.mxu0 %v2023_v8  ;;  %900 = vst [vmem:[#allocation2 + $0xe8] sm:$0xff] %v2063_v51  ;;  %v2049_v59 = vld [vmem:[%s2576_s9 + $0x28] sm:$0xff]   ;;  %v2050_v60 = vld [vmem:[%s2576_s9 + $0x20] sm:$0xff]   ;;  %v2051_v61 = vld [vmem:[%s2576_s9 + $0x18] sm:$0xff]  }
  0x1f   : > { %1903 = vmatpush3.bf16.msra.mxu1 %v2024_v9  ;;  %1880 = vmatprep.subr.bf16.mxu0 %v2025_v10  ;;  %v2052_v62 = vld [vmem:[%s2576_s9 + $0x10] sm:$0xff]   ;;  %v2053_v63 = vld [vmem:[%s2576_s9 + $0x8] sm:$0xff]   ;;  %v2054_v0 = vld [vmem:[%s2576_s9] sm:$0xff]  }
  0x20   : > { %1904 = vmatprep.subr.bf16.mxu1 %v2026_v14  ;;  %v910_v6 = vld [vmem:[%s2573_s6] sm:$0xff]  ;;  %v968_v29 = vld [vmem:[#allocation2 + $0x9] sm:$0xff] }
  0x21   : > { %v2337_v8 = vld [vmem:[%s2571_s4] ss:$0 sm:$0xff]  ;;  %v2339_v9 = vrot.slane %v910_v6, %v922_v3  ;;  %v912_v13 = vld [vmem:[#allocation2 + $0x7] sm:$0xff]  ;;  %v2346_v16 = vrot.slane %v910_v6, %v950_v4 }
  0x22   : > { %1881 = vmatpush3.bf16.msra.mxu0 %v2025_v10  ;;  %v978_v10 = vsub.s32 2, %v921_v2 }
  0x23   : > { %1905 = vmatpush3.bf16.msra.mxu1 %v2026_v14  ;;  %1882 = vmatprep.subr.bf16.mxu0 %v2027_v18  ;;  %v2344_v14 = vld [vmem:[%s2572_s5] ss:$0 sm:$0xff]  ;;  %v952_v22 = vmul.f32 0.0, %v2346_v16 }
  0x24   : > { %1906 = vmatprep.subr.bf16.mxu1 %v2028_v19  ;;  %v2351_v23 = vrot.slane %v910_v6, %v978_v10 }
  0x26   : > { %1883 = vmatpush3.bf16.msra.mxu0 %v2027_v18  ;;  %v980_v41 = vmul.f32 %v2351_v23, %v968_v29 }
  0x27   : > { %1907 = vmatpush3.bf16.msra.mxu1 %v2028_v19  ;;  %1884 = vmatprep.subr.bf16.mxu0 %v2029_v20 }
  0x28   : > { %1908 = vmatprep.subr.bf16.mxu1 %v2030_v21 }
  0x2a   : > { %1885 = vmatpush3.bf16.msra.mxu0 %v2029_v20 }
  0x2b   : > { %1909 = vmatpush3.bf16.msra.mxu1 %v2030_v21  ;;  %1918 = vmatprep.subr.bf16.mxu0 %v2031_v28  ;;  %v924_v21 = vmul.f32 %v2339_v9, %v912_v13 }
  0x2c   : > { %1942 = vmatprep.subr.bf16.mxu1 %v2032_v31 }
  0x2d   : > { %1887 = vmatmul.mubr.bf16.vlgmr.msra.gmra.mxu0 %v2237_v32  ;;  %v960_v40 = vadd.f32 %v952_v22, %v924_v21 }
  0x2e   : > { %1911 = vmatmul.mubr.bf16.vlgmr.msra.gmra.mxu1 %v2239_v33  ;;  %1890 = vmatprep.mubr.bf16.mxu0 %v2241_v34 }
  0x2f   : > { %1914 = vmatprep.mubr.bf16.mxu1 %v2246_v36  ;;  %1919 = vmatpush3.bf16.msra.mxu0 %v2031_v28 }
  0x30   : > { %1920 = vmatprep.subr.bf16.mxu0 %v2033_v35  ;;  %1943 = vmatpush3.bf16.msra.mxu1 %v2032_v31  ;;  %v1006_v31 = vsub.s32 3, %v921_v2 }
  0x31   : > { %1944 = vmatprep.subr.bf16.mxu1 %v2034_v37 }
  0x32   : > { %v2362_v51 = vrot.slane %v910_v6, %v1006_v31 }
  0x33   : > { %1921 = vmatpush3.bf16.msra.mxu0 %v2033_v35 }
  0x34   : > { %1922 = vmatprep.subr.bf16.mxu0 %v2035_v42  ;;  %1945 = vmatpush3.bf16.msra.mxu1 %v2034_v37 }
  0x35   : > { %1891 = vmatmul.mubr.bf16.gmra.mxu0 %v2262_v43  ;;  %1946 = vmatprep.subr.bf16.mxu1 %v2036_v45 }
  0x36   : > { %1915 = vmatmul.mubr.bf16.gmra.mxu1 %v2264_v44  ;;  %1934 = vmatprep.mubr.bf16.mxu0 %v579_v15 }
  0x37   : > { %1923 = vmatpush3.bf16.msra.mxu0 %v2035_v42  ;;  %1958 = vmatprep.mubr.bf16.mxu1 %v559_v17  ;;  %v1091_v42 = vsub.s32 6, %v921_v2 }
  0x38   : > { %1924 = vmatprep.subr.bf16.mxu0 %v2037_v46  ;;  %1947 = vmatpush3.bf16.msra.mxu1 %v2036_v45 }
  0x39   : > { %1948 = vmatprep.subr.bf16.mxu1 %v2038_v47 }
  0x3b   : > { %1925 = vmatpush3.bf16.msra.mxu0 %v2037_v46 }
  0x3c   : > { %1926 = vmatprep.subr.bf16.mxu0 %v2039_v48  ;;  %1949 = vmatpush3.bf16.msra.mxu1 %v2038_v47 }
  0x3d   : > { %1950 = vmatprep.subr.bf16.mxu1 %v2040_v49 }
  0x3f   : > { %1927 = vmatpush3.bf16.msra.mxu0 %v2039_v48 }
  0x40   : > { %1928 = vmatprep.subr.bf16.mxu0 %v2041_v50  ;;  %1951 = vmatpush3.bf16.msra.mxu1 %v2040_v49 }
  0x41   : > { %1952 = vmatprep.subr.bf16.mxu1 %v2042_v52 }
  0x43   : > { %1929 = vmatpush3.bf16.msra.mxu0 %v2041_v50 }
  0x44   : > { %1930 = vmatprep.subr.bf16.mxu0 %v2043_v53  ;;  %1953 = vmatpush3.bf16.msra.mxu1 %v2042_v52 }
  0x45   : > { %1954 = vmatprep.subr.bf16.mxu1 %v2044_v54 }
  0x47   : > { %1931 = vmatpush3.bf16.msra.mxu0 %v2043_v53 }
  0x48   : > { %1932 = vmatprep.subr.bf16.mxu0 %v2045_v55  ;;  %1955 = vmatpush3.bf16.msra.mxu1 %v2044_v54 }
  0x49   : > { %1956 = vmatprep.subr.bf16.mxu1 %v2046_v56 }
  0x4b   : > { %1933 = vmatpush3.bf16.msra.mxu0 %v2045_v55 }
  0x4c   : > { %1957 = vmatpush3.bf16.msra.mxu1 %v2046_v56  ;;  %1966 = vmatprep.subr.bf16.mxu0 %v2047_v57 }
  0x4d   : > { %1990 = vmatprep.subr.bf16.mxu1 %v2047_v57 }
  0x4e   : > { %1935 = vmatmul.mubr.bf16.vlgmr.msra.gmra.mxu0 %v2237_v32  ;;  %v1034_v32 = vsub.s32 4, %v921_v2 }
  0x4f   : > { %1967 = vmatpush3.bf16.msra.mxu0 %v2047_v57  ;;  %1938 = vmatprep.mubr.bf16.mxu0 %v2241_v34 }
  0x50   : > { %1959 = vmatmul.mubr.bf16.vlgmr.msra.gmra.mxu1 %v2239_v33  ;;  %1968 = vmatprep.subr.bf16.mxu0 %v2048_v58  ;;  %v1062_v33 = vsub.s32 5, %v921_v2  ;;  %v2364_v52 = vrot.slane %v910_v6, %v1034_v32 }
  0x51   : > { %1998 = vmatpush3.bf16.msra.mxu1 %v2047_v57  ;;  %1962 = vmatprep.mubr.bf16.mxu1 %v2246_v36 }
  0x52   : > { %1991 = vmatprep.subr.bf16.mxu1 %v2048_v58  ;;  %v2366_v53 = vrot.slane %v910_v6, %v1062_v33 }
  0x53   : > { %1969 = vmatpush3.bf16.msra.mxu0 %v2048_v58 }
  0x54   : > { %1970 = vmatprep.subr.bf16.mxu0 %v2049_v59 }
  0x55   : > { %1999 = vmatpush3.bf16.msra.mxu1 %v2048_v58 }
  0x56   : > { %1992 = vmatprep.subr.bf16.mxu1 %v2049_v59  ;;  %1939 = vmatmul.mubr.bf16.gmra.mxu0 %v2262_v43  ;;  %v2358_v43 = vrot.slane %v910_v6, %v1119_v24 }
  0x57   : > { %1971 = vmatpush3.bf16.msra.mxu0 %v2049_v59 }
  0x58   : > { %1972 = vmatprep.subr.bf16.mxu0 %v2050_v60  ;;  %1963 = vmatmul.mubr.bf16.gmra.mxu1 %v2264_v44 }
  0x59   : > { %2000 = vmatpush3.bf16.msra.mxu1 %v2049_v59 }
  0x5a   : > { %1993 = vmatprep.subr.bf16.mxu1 %v2050_v60 }
  0x5b   : > { %1973 = vmatpush3.bf16.msra.mxu0 %v2050_v60 }
  0x5c   : > { %1974 = vmatprep.subr.bf16.mxu0 %v2051_v61 }
  0x5d   : > { %2001 = vmatpush3.bf16.msra.mxu1 %v2050_v60 }
  0x5e   : > { %1994 = vmatprep.subr.bf16.mxu1 %v2051_v61 }
  0x5f   : > { %1975 = vmatpush3.bf16.msra.mxu0 %v2051_v61 }
  0x60   : > { %1976 = vmatprep.subr.bf16.mxu0 %v2052_v62 }
  0x61   : > { %2002 = vmatpush3.bf16.msra.mxu1 %v2051_v61  ;;  %v2370_v61 = vadd.f32 %v980_v41, %v960_v40 }
  0x62   : > { %1995 = vmatprep.subr.bf16.mxu1 %v2052_v62 }
  0x63   : > { %1977 = vmatpush3.bf16.msra.mxu0 %v2052_v62 }
  0x64   : > { %1978 = vmatprep.subr.bf16.mxu0 %v2053_v63 }
  0x65   : > { %2003 = vmatpush3.bf16.msra.mxu1 %v2052_v62  ;;  %v2372_v62 = vrot.slane %v910_v6, %v1091_v42 }
  0x66   : > { %1996 = vmatprep.subr.bf16.mxu1 %v2053_v63 }
  0x67   : > { %1979 = vmatpush3.bf16.msra.mxu0 %v2053_v63 }
  0x68   : > { %1980 = vmatprep.subr.bf16.mxu0 %v2054_v0 }
  0x69   : > { %2004 = vmatpush3.bf16.msra.mxu1 %v2053_v63 }
  0x6a   : > { %1997 = vmatprep.subr.bf16.mxu1 %v2054_v0 }
  0x6b   : > { %1981 = vmatpush3.bf16.msra.mxu0 %v2054_v0 }
  0x6d   : > { %2005 = vmatpush3.bf16.msra.mxu1 %v2054_v0 }
  0xed   : > { %v1888_v5 = vpop.f32.mrf.mxu0 }
  0xee   : > { %v1912_v7 = vpop.f32.mrf.mxu1 }
  0xef   : > { %v803_v11 = vadd.f32 %v1912_v7, %v1888_v5  ;;  %v681_v12 = vpop.f32.mrf.mxu0 }
  0xf0   : > { %v794_v15 = vpop.f32.mrf.mxu1 }
  0xf1   : > { %v834_v17 = vmul.f32 %v2337_v8, %v803_v11  ;;  %v795_v18 = vadd.f32 %v794_v15, %v681_v12  ;;  %v1889_v19 = vpop.f32.mrf.mxu0 }
  0xf2   : > { %v1913_v20 = vpop.f32.mrf.mxu1 }
  0xf3   : > { %v849_v25 = vadd.f32 %v2344_v14, %v834_v17  ;;  %v832_v26 = vmul.f32 %v2337_v8, %v795_v18  ;;  %v806_v27 = vadd.f32 %v1913_v20, %v1889_v19  ;;  %v684_v28 = vpop.f32.mrf.mxu0 }
  0xf4   : > { %v797_v30 = vpop.f32.mrf.mxu1 }
  0xf5   : > { %v857_v34 = vmax.f32 %v849_v25, 0.0  ;;  %v847_v35 = vadd.f32 %v2344_v14, %v832_v26  ;;  %v835_v36 = vmul.f32 %v2337_v8, %v806_v27  ;;  %v798_v37 = vadd.f32 %v797_v30, %v684_v28  ;;  %v1892_v38 = vpop.f32.mrf.mxu0  ;;  %v2398_v26 = vld [vmem:[%s2573_s6 + $0x8] ss:$0 sm:$0xff] }
  0xf6   : > { %v1916_v39 = vpop.f32.mrf.mxu1 }
  0xf7   : > { %v865_v44 = vmin.f32 %v857_v34, 6.0  ;;  %v855_v45 = vmax.f32 %v847_v35, 0.0  ;;  %v850_v46 = vadd.f32 %v2344_v14, %v835_v36  ;;  %v833_v47 = vmul.f32 %v2337_v8, %v798_v37  ;;  %v697_v48 = vpop.f32.mrf.mxu0 }
  0xf8   : > { %v819_v49 = vadd.f32 %v1916_v39, %v1892_v38  ;;  %v810_v50 = vpop.f32.mrf.mxu1 }
  0xf9   : > { %904 = vst [vmem:[#allocation2 + $0x50] sm:$0xff] %v865_v44  ;;  %v863_v54 = vmin.f32 %v855_v45, 6.0  ;;  %v858_v55 = vmax.f32 %v850_v46, 0.0  ;;  %v848_v56 = vadd.f32 %v2344_v14, %v833_v47  ;;  %v811_v57 = vadd.f32 %v810_v50, %v697_v48  ;;  %v1893_v58 = vpop.f32.mrf.mxu0 }
  0xfa   : > { %v838_v59 = vmul.f32 %v2337_v8, %v819_v49  ;;  %v1917_v60 = vpop.f32.mrf.mxu1  ;;  %v2375_v63 = vmul.f32 %v2358_v43, %v865_v44  ;;  %v955_v11 = vmul.f32 %v2346_v16, %v865_v44  ;;  %v2382_v6 = vmul.f32 %v2364_v52, %v865_v44 }
  0xfb   : > { %902 = vst [vmem:[#allocation2 + $0x20] sm:$0xff] %v863_v54  ;;  %v866_v0 = vmin.f32 %v858_v55, 6.0  ;;  %v856_v1 = vmax.f32 %v848_v56, 0.0  ;;  %v836_v2 = vmul.f32 %v2337_v8, %v811_v57  ;;  %v822_v3 = vadd.f32 %v1917_v60, %v1893_v58  ;;  %v700_v4 = vpop.f32.mrf.mxu0 }
  0xfc   : > { %v853_v5 = vadd.f32 %v2344_v14, %v838_v59  ;;  %v813_v7 = vpop.f32.mrf.mxu1  ;;  %v953_v10 = vmul.f32 %v2346_v16, %v863_v54  ;;  %v1036_v19 = vmul.f32 %v2364_v52, %v863_v54 }
  0xfd   : > { %905 = vst [vmem:[#allocation2 + $0x68] sm:$0xff] %v866_v0  ;;  %v864_v12 = vmin.f32 %v856_v1, 6.0  ;;  %v851_v13 = vadd.f32 %v2344_v14, %v836_v2  ;;  %v839_v15 = vmul.f32 %v2337_v8, %v822_v3  ;;  %v814_v17 = vadd.f32 %v813_v7, %v700_v4 }
  0xfe   : > { %v861_v18 = vmax.f32 %v853_v5, 0.0  ;;  %v2388_v20 = vmul.f32 %v2364_v52, %v866_v0  ;;  %v2391_v21 = vmul.f32 %v2358_v43, %v866_v0  ;;  %v2401_v27 = vmul.f32 %v2346_v16, %v866_v0 }
  0xff   : > { %903 = vst [vmem:[#allocation2 + $0x38] sm:$0xff] %v864_v12  ;;  %v859_v22 = vmax.f32 %v851_v13, 0.0  ;;  %v854_v24 = vadd.f32 %v2344_v14, %v839_v15  ;;  %v837_v25 = vmul.f32 %v2337_v8, %v814_v17  ;;  %v1037_v29 = vmul.f32 %v2364_v52, %v864_v12 }
 0x100   : > { %v2403_v28 = vmin.f32 %v861_v18, 6.0  ;;  %v1082_v30 = vld [vmem:[#allocation2 + $0x4f] sm:$0xff]  ;;  %v2407_v31 = vmul.f32 %v2358_v43, %v864_v12  ;;  %v954_v33 = vmul.f32 %v2346_v16, %v864_v12 }
 0x101   : > { %v1138_v32 = vld [vmem:[#allocation2 + $0x51] sm:$0xff]  ;;  %v2410_v8 = vmin.f32 %v859_v22, 6.0  ;;  %v862_v34 = vmax.f32 %v854_v24, 0.0  ;;  %v852_v35 = vadd.f32 %v2344_v14, %v837_v25  ;;  %v2414_v36 = vmul.f32 %v2372_v62, %v1082_v30 }
 0x102   : > { %908 = vst [vmem:[#allocation2 + $0xb0] sm:$0xff] %v2403_v28  ;;  %v913_v37 = vld [vmem:[#allocation2 + $0x1f] sm:$0xff]  ;;  %v2418_v39 = vmul.f32 %v2398_v26, %v1138_v32  ;;  %v927_v40 = vmul.f32 %v1082_v30, %v2339_v9  ;;  %v983_v41 = vmul.f32 %v1138_v32, %v2351_v23  ;;  %v1010_v42 = vmul.f32 %v1082_v30, %v2362_v51 }
 0x103   : > { %v969_v38 = vld [vmem:[#allocation2 + $0x21] sm:$0xff]  ;;  %906 = vst [vmem:[#allocation2 + $0x80] sm:$0xff] %v2410_v8  ;;  %v2424_v44 = vmin.f32 %v862_v34, 6.0  ;;  %v860_v14 = vmax.f32 %v852_v35, 0.0  ;;  %v925_v45 = vmul.f32 %v2339_v9, %v913_v37  ;;  %v1008_v47 = vmul.f32 %v2362_v51, %v913_v37 }
 0x104   : > { %v981_v46 = vmul.f32 %v2351_v23, %v969_v38  ;;  %v1064_v48 = vmul.f32 %v2366_v53, %v969_v38  ;;  %v963_v49 = vadd.f32 %v955_v11, %v927_v40  ;;  %v999_v50 = vld [vmem:[#allocation2 + $0x67] sm:$0xff]  ;;  %v2431_v55 = vmul.f32 %v1138_v32, %v2366_v53 }
 0x105   : > { %v1055_v54 = vld [vmem:[#allocation2 + $0x69] sm:$0xff]  ;;  %909 = vst [vmem:[#allocation2 + $0xc8] sm:$0xff] %v2424_v44  ;;  %v2434_v56 = vmin.f32 %v860_v14, 6.0  ;;  %v961_v57 = vadd.f32 %v953_v10, %v925_v45  ;;  %v1011_v58 = vmul.f32 %v2362_v51, %v999_v50  ;;  %v1016_v0 = vadd.f32 %v1008_v47, %v2370_v61 }
 0x106   : > { %v1067_v59 = vmul.f32 %v2366_v53, %v1055_v54  ;;  %v997_v60 = vld [vmem:[#allocation2 + $0x37] sm:$0xff]  ;;  %v991_v2 = vadd.f32 %v983_v41, %v963_v49  ;;  %v2440_v3 = vmul.f32 %v2372_v62, %v999_v50  ;;  %v1124_v4 = vmul.f32 %v2358_v43, %v2410_v8 }
 0x107   : > { %v1053_v1 = vld [vmem:[#allocation2 + $0x39] sm:$0xff]  ;;  %907 = vst [vmem:[#allocation2 + $0x98] sm:$0xff] %v2434_v56  ;;  %v989_v5 = vadd.f32 %v981_v46, %v961_v57  ;;  %v1009_v7 = vmul.f32 %v2362_v51, %v997_v60  ;;  %v1093_v11 = vmul.f32 %v2372_v62, %v997_v60  ;;  %v1044_v12 = vadd.f32 %v1036_v19, %v1016_v0 }
 0x108   : > { %v1065_v10 = vmul.f32 %v2366_v53, %v1053_v1  ;;  %v1149_v61 = vmul.f32 %v2398_v26, %v1053_v1  ;;  %v926_v13 = vmul.f32 %v997_v60, %v2339_v9  ;;  %v982_v15 = vmul.f32 %v1053_v1, %v2351_v23  ;;  %v2470_v0 = vld [vmem:[%s2574_s7] ss:$0 sm:$0xff] }
 0x109   : > { %v1017_v17 = vadd.f32 %v1009_v7, %v989_v5  ;;  %v1019_v18 = vadd.f32 %v1011_v58, %v991_v2  ;;  %v2452_v22 = vmul.f32 %v2398_v26, %v1055_v54  ;;  %v928_v24 = vmul.f32 %v999_v50, %v2339_v9 }
 0x10a   : > { %v1072_v25 = vadd.f32 %v1064_v48, %v1044_v12  ;;  %v962_v30 = vadd.f32 %v954_v33, %v926_v13  ;;  %v1084_v32 = vld [vmem:[#allocation2 + $0x7f] sm:$0xff]  ;;  %v957_v19 = vmul.f32 %v2346_v16, %v2410_v8  ;;  %v984_v35 = vmul.f32 %v1055_v54, %v2351_v23 }
 0x10b   : > { %v1140_v34 = vld [vmem:[#allocation2 + $0x81] sm:$0xff]  ;;  %v1045_v37 = vadd.f32 %v1037_v29, %v1017_v17  ;;  %v1047_v38 = vadd.f32 %v2388_v20, %v1019_v18  ;;  %v1096_v40 = vmul.f32 %v2372_v62, %v1084_v32  ;;  %v929_v46 = vmul.f32 %v1084_v32, %v2339_v9  ;;  %v1086_v17 = vld [vmem:[#allocation2 + $0xaf] sm:$0xff] }
 0x10c   : > { %v1152_v41 = vmul.f32 %v2398_v26, %v1140_v34  ;;  %v1101_v14 = vadd.f32 %v1093_v11, %v1072_v25  ;;  %v990_v45 = vadd.f32 %v982_v15, %v962_v30  ;;  %v964_v33 = vadd.f32 %v2401_v27, %v928_v24 }
 0x10d   : > { %v1073_v47 = vadd.f32 %v1065_v10, %v1045_v37  ;;  %v1075_v48 = vadd.f32 %v1067_v59, %v1047_v38  ;;  %v985_v49 = vmul.f32 %v1140_v34, %v2351_v23  ;;  %v1012_v50 = vmul.f32 %v1084_v32, %v2362_v51 }
 0x10e   : > { %v1129_v29 = vadd.f32 %v2407_v31, %v1101_v14  ;;  %v1018_v54 = vadd.f32 %v1010_v42, %v990_v45  ;;  %v965_v20 = vadd.f32 %v957_v19, %v929_v46  ;;  %v992_v57 = vadd.f32 %v984_v35, %v964_v33  ;;  %v1001_v58 = vld [vmem:[#allocation2 + $0x97] sm:$0xff] }
 0x10f   : > { %v1102_v60 = vadd.f32 %v2414_v36, %v1073_v47  ;;  %v1104_v27 = vadd.f32 %v1096_v40, %v1075_v48  ;;  %v1013_v59 = vmul.f32 %v2362_v51, %v1001_v58  ;;  %v1040_v1 = vmul.f32 %v2364_v52, %v2410_v8  ;;  %v1057_v7 = vld [vmem:[#allocation2 + $0x99] sm:$0xff]  ;;  %v1142_v14 = vld [vmem:[#allocation2 + $0xb1] sm:$0xff] }
 0x110   : > { %v1157_v2 = vadd.f32 %v1149_v61, %v1129_v29  ;;  %v1046_v31 = vadd.f32 %v2382_v6, %v1018_v54  ;;  %v993_v42 = vadd.f32 %v985_v49, %v965_v20  ;;  %v1020_v5 = vadd.f32 %v1012_v50, %v992_v57  ;;  %v2480_v36 = vld [vmem:[%s2575_s8] ss:$0 sm:$0xff] }
 0x111   : > { %v1130_v10 = vadd.f32 %v2375_v63, %v1102_v60  ;;  %v1132_v11 = vadd.f32 %v1124_v4, %v1104_v27  ;;  %v1041_v12 = vmul.f32 %v2364_v52, %v2434_v56  ;;  %v1068_v13 = vmul.f32 %v1140_v34, %v2366_v53 }
 0x112   : > { %v1172_v8 = vmul.f32 %v2470_v0, %v1157_v2  ;;  %v1074_v6 = vadd.f32 %v2431_v55, %v1046_v31  ;;  %v1021_v61 = vadd.f32 %v1013_v59, %v993_v42  ;;  %v1048_v15 = vadd.f32 %v1040_v1, %v1020_v5 }
 0x113   : > { %v1158_v63 = vadd.f32 %v2418_v39, %v1130_v10  ;;  %v1160_v18 = vadd.f32 %v1152_v41, %v1132_v11  ;;  %v1069_v24 = vmul.f32 %v2366_v53, %v1057_v7  ;;  %v1097_v25 = vmul.f32 %v2372_v62, %v1001_v58  ;;  %v1003_v10 = vld [vmem:[#allocation2 + $0xc7] sm:$0xff] }
 0x114   : > { %v1187_v4 = vadd.f32 %v2480_v36, %v1172_v8  ;;  %v1103_v30 = vadd.f32 %v2440_v3, %v1074_v6  ;;  %v1049_v32 = vadd.f32 %v1041_v12, %v1021_v61  ;;  %v1076_v34 = vadd.f32 %v1068_v13, %v1048_v15 }
 0x115   : > { %v1173_v19 = vmul.f32 %v2470_v0, %v1158_v63  ;;  %v1175_v55 = vmul.f32 %v2470_v0, %v1160_v18  ;;  %v1098_v35 = vmul.f32 %v2372_v62, %v1086_v17  ;;  %v1125_v39 = vmul.f32 %v2358_v43, %v2434_v56  ;;  %v1088_v18 = vld [vmem:[#allocation2 + $0xdf] sm:$0xff] }
 0x116   : > { %v1195_v37 = vmax.f32 %v1187_v4, 0.0  ;;  %v1131_v38 = vadd.f32 %v2391_v21, %v1103_v30  ;;  %v1077_v40 = vadd.f32 %v1069_v24, %v1049_v32  ;;  %v1105_v41 = vadd.f32 %v1097_v25, %v1076_v34  ;;  %v1059_v30 = vld [vmem:[#allocation2 + $0xc9] sm:$0xff] }
 0x117   : > { %v1188_v45 = vadd.f32 %v2480_v36, %v1173_v19  ;;  %v1190_v3 = vadd.f32 %v2480_v36, %v1175_v55  ;;  %v1126_v46 = vmul.f32 %v2358_v43, %v2403_v28  ;;  %v1153_v49 = vmul.f32 %v2398_v26, %v1057_v7 }
 0x118   : > { %v1159_v33 = vadd.f32 %v2452_v22, %v1131_v38  ;;  %v1106_v47 = vadd.f32 %v1098_v35, %v1077_v40  ;;  %v1133_v48 = vadd.f32 %v1125_v39, %v1105_v41  ;;  %v1203_v29 = vmin.f32 %v1195_v37, 6.0 }
 0x119   : > { %v1196_v50 = vmax.f32 %v1188_v45, 0.0  ;;  %v1154_v21 = vmul.f32 %v2398_v26, %v1142_v14  ;;  %v930_v54 = vmul.f32 %v1001_v58, %v2339_v9  ;;  %v931_v27 = vmul.f32 %v1086_v17, %v2339_v9  ;;  %v1144_v45 = vld [vmem:[#allocation2 + $0xe1] sm:$0xff] }
 0x11a   : > { %v1174_v20 = vmul.f32 %v2470_v0, %v1159_v33  ;;  %v1134_v57 = vadd.f32 %v1126_v46, %v1106_v47  ;;  %v1161_v60 = vadd.f32 %v1153_v49, %v1133_v48  ;;  %v1198_v1 = vmax.f32 %v1190_v3, 0.0 }
 0x11b   : > { %v1204_v59 = vmin.f32 %v1196_v50, 6.0  ;;  %v958_v22 = vmul.f32 %v2346_v16, %v2434_v56  ;;  %v959_v2 = vmul.f32 %v2346_v16, %v2403_v28  ;;  %v986_v58 = vmul.f32 %v1057_v7, %v2351_v23 }
 0x11c   : > { %v1189_v31 = vadd.f32 %v2480_v36, %v1174_v20  ;;  %v1162_v42 = vadd.f32 %v1154_v21, %v1134_v57  ;;  %v1176_v5 = vmul.f32 %v2470_v0, %v1161_v60  ;;  %v987_v9 = vmul.f32 %v1142_v14, %v2351_v23 }
 0x11d   : > { %v1499_v11 = vpack.c.bf16 %v1204_v59, %v1203_v29  ;;  %v966_v12 = vadd.f32 %v958_v22, %v930_v54  ;;  %v967_v13 = vadd.f32 %v959_v2, %v931_v27  ;;  %v1014_v15 = vmul.f32 %v1086_v17, %v2362_v51  ;;  %v1936_v22 = vpop.f32.mrf.mxu0 }
 0x11e   : > { %v1197_v8 = vmax.f32 %v1189_v31, 0.0  ;;  %v1177_v6 = vmul.f32 %v2470_v0, %v1162_v42  ;;  %v1191_v56 = vadd.f32 %v2480_v36, %v1176_v5  ;;  %v1015_v63 = vmul.f32 %v2362_v51, %v1003_v10  ;;  %v1960_v5 = vpop.f32.mrf.mxu1 }
 0x11f   : > { %1982 = vmatprep.mubr.bf16.mxu0 %v1499_v11  ;;  %v994_v16 = vadd.f32 %v986_v58, %v966_v12  ;;  %v995_v61 = vadd.f32 %v987_v9, %v967_v13  ;;  %v1206_v24 = vmin.f32 %v1198_v1, 6.0  ;;  %v1042_v34 = vmul.f32 %v2364_v52, %v2403_v28  ;;  %v1325_v2 = vpop.f32.mrf.mxu0 }
 0x120   : > { %v1205_v7 = vmin.f32 %v1197_v8, 6.0  ;;  %v1192_v25 = vadd.f32 %v2480_v36, %v1177_v6  ;;  %v1199_v4 = vmax.f32 %v1191_v56, 0.0  ;;  %v1043_v19 = vmul.f32 %v2364_v52, %v2424_v44  ;;  %v1803_v6 = vld [vmem:[%s2577_s10] ss:$0 sm:$0xff] }
 0x121   : > { %v1022_v23 = vadd.f32 %v1014_v15, %v994_v16  ;;  %v1023_v32 = vadd.f32 %v1015_v63, %v995_v61  ;;  %v1100_v17 = vmul.f32 %v2372_v62, %v1088_v18  ;;  %v1070_v37 = vmul.f32 %v1142_v14, %v2366_v53  ;;  %v1937_v31 = vpop.f32.mrf.mxu0  ;;  %v1794_v61 = vld [vmem:[%s2582_s15] ss:$0 sm:$0xff] }
 0x122   : > { %v1500_v55 = vpack.c.bf16 %v1206_v24, %v1205_v7  ;;  %v1200_v35 = vmax.f32 %v1192_v25, 0.0  ;;  %v1071_v38 = vmul.f32 %v2366_v53, %v1059_v30  ;;  %v1207_v40 = vmin.f32 %v1199_v4, 6.0  ;;  %v1804_v18 = vld [vmem:[%s2578_s11] ss:$0 sm:$0xff] }
 0x123   : > { %v1050_v51 = vadd.f32 %v1042_v34, %v1022_v23  ;;  %v1051_v39 = vadd.f32 %v1043_v19, %v1023_v32  ;;  %v1099_v28 = vmul.f32 %v2372_v62, %v1003_v10  ;;  %v1128_v52 = vmul.f32 0.0, %v2358_v43  ;;  %v1438_v10 = vpop.f32.mrf.mxu1 }
 0x124   : > { %1983 = vmatmul.mubr.bf16.vlgmr.msra.gmra.mxu0 %v1500_v55  ;;  %v1208_v41 = vmin.f32 %v1200_v35, 6.0  ;;  %v1127_v49 = vmul.f32 %v2358_v43, %v2424_v44  ;;  %v1156_v14 = vmul.f32 %v2398_v26, %v1144_v45  ;;  %v1155_v29 = vmul.f32 %v2398_v26, %v1059_v30  ;;  %v1328_v26 = vpop.f32.mrf.mxu0 }
 0x125   : > { %v1078_v3 = vadd.f32 %v1070_v37, %v1050_v51  ;;  %v1079_v46 = vadd.f32 %v1071_v38, %v1051_v39  ;;  %v1447_v12 = vadd.f32 %v1960_v5, %v1936_v22  ;;  %v1439_v13 = vadd.f32 %v1438_v10, %v1325_v2 }
 0x126   : > { %v1501_v33 = vpack.c.bf16 %v1208_v41, %v1207_v40  ;;  %v1940_v42 = vpop.f32.mrf.mxu0 }
 0x127   : > { %v1107_v47 = vadd.f32 %v1099_v28, %v1078_v3  ;;  %v1108_v48 = vadd.f32 %v1100_v17, %v1079_v46 }
 0x128   : > { %1986 = vmatprep.mubr.bf16.mxu1 %v1501_v33  ;;  %v1341_v58 = vpop.f32.mrf.mxu0 }
 0x129   : > { %v1135_v53 = vadd.f32 %v1127_v49, %v1107_v47  ;;  %v1136_v50 = vadd.f32 %v1128_v52, %v1108_v48 }
 0x12a   : > { %v1941_v11 = vpop.f32.mrf.mxu0 }
 0x12b   : > { %v1163_v21 = vadd.f32 %v1155_v29, %v1135_v53  ;;  %v1164_v54 = vadd.f32 %v1156_v14, %v1136_v50 }
 0x12c   : > { %v1344_v9 = vpop.f32.mrf.mxu0 }
 0x12d   : > { %v1178_v20 = vmul.f32 %v2470_v0, %v1163_v21  ;;  %v1179_v62 = vmul.f32 %v2470_v0, %v1164_v54  ;;  %v1961_v0 = vpop.f32.mrf.mxu1 }
 0x12e   : > { %v1450_v16 = vadd.f32 %v1961_v0, %v1937_v31 }
 0x12f   : > { %v1193_v57 = vadd.f32 %v2480_v36, %v1178_v20  ;;  %v1194_v60 = vadd.f32 %v2480_v36, %v1179_v62  ;;  %v1793_v36 = vld [vmem:[%s2581_s14] ss:$0 sm:$0xff]  ;;  %v1441_v8 = vpop.f32.mrf.mxu1 }
 0x130   : > { %v1478_v56 = vmul.f32 %v1793_v36, %v1447_v12  ;;  %v1476_v15 = vmul.f32 %v1793_v36, %v1439_v13  ;;  %v1442_v7 = vadd.f32 %v1441_v8, %v1328_v26  ;;  %v1479_v30 = vmul.f32 %v1793_v36, %v1450_v16 }
 0x131   : > { %v1201_v27 = vmax.f32 %v1193_v57, 0.0  ;;  %v1202_v59 = vmax.f32 %v1194_v60, 0.0  ;;  %v1964_v35 = vpop.f32.mrf.mxu1 }
 0x132   : > { %v1493_v4 = vadd.f32 %v1794_v61, %v1478_v56  ;;  %v1491_v34 = vadd.f32 %v1794_v61, %v1476_v15  ;;  %v1477_v55 = vmul.f32 %v1793_v36, %v1442_v7  ;;  %v1494_v38 = vadd.f32 %v1794_v61, %v1479_v30 }
 0x133   : > { %v1209_v43 = vmin.f32 %v1201_v27, 6.0  ;;  %v1210_v44 = vmin.f32 %v1202_v59, 6.0  ;;  %v1454_v46 = vpop.f32.mrf.mxu1  ;;  %v1463_v48 = vadd.f32 %v1964_v35, %v1940_v42 }
 0x134   : > { %v1492_v3 = vadd.f32 %v1794_v61, %v1477_v55  ;;  %v1455_v49 = vadd.f32 %v1454_v46, %v1341_v58 }
 0x135   : > { %v1502_v1 = vpack.c.bf16 %v1210_v44, %v1209_v43  ;;  %v1965_v47 = vpop.f32.mrf.mxu1  ;;  %v1482_v53 = vmul.f32 %v1793_v36, %v1463_v48 }
 0x136   : > { %v1466_v50 = vadd.f32 %v1965_v47, %v1941_v11  ;;  %v1480_v29 = vmul.f32 %v1793_v36, %v1455_v49 }
 0x137   : > { %1987 = vmatmul.mubr.bf16.vlgmr.msra.gmra.mxu1 %v1502_v1  ;;  %v1457_v14 = vpop.f32.mrf.mxu1  ;;  %v1497_v57 = vadd.f32 %v1794_v61, %v1482_v53 }
 0x138   : > { %v1458_v54 = vadd.f32 %v1457_v14, %v1344_v9  ;;  %v1483_v60 = vmul.f32 %v1793_v36, %v1466_v50  ;;  %v1495_v43 = vadd.f32 %v1794_v61, %v1480_v29 }
 0x13a   : > { %v1481_v1 = vmul.f32 %v1793_v36, %v1458_v54  ;;  %v1498_v42 = vadd.f32 %v1794_v61, %v1483_v60 }
 0x13c   : > { %v1496_v11 = vadd.f32 %v1794_v61, %v1481_v1 }
 0x1e4   : > { %v1984_v63 = vpop.f32.mrf.mxu0 }
 0x1e5   : > { %v1641_v24 = vmul.f32 %v1984_v63, %v1803_v6 }
 0x1e6   : > { %v1601_v25 = vpop.f32.mrf.mxu0 }
 0x1e7   : > { %v1656_v23 = vadd.f32 %v1804_v18, %v1641_v24  ;;  %v1639_v32 = vmul.f32 %v1803_v6, %v1601_v25 }
 0x1e8   : > { %v1985_v19 = vpop.f32.mrf.mxu0 }
 0x1e9   : > { %v1664_v17 = vadd.f32 %v1656_v23, %v1493_v4  ;;  %v1654_v51 = vadd.f32 %v1804_v18, %v1639_v32  ;;  %v1642_v39 = vmul.f32 %v1985_v19, %v1803_v6 }
 0x1ea   : > { %v1604_v37 = vpop.f32.mrf.mxu0 }
 0x1eb   : > { %1672 = vst [vmem:[%s2554_s0 + $0x10] sm:$0xff] %v1664_v17  ;;  %v1662_v40 = vadd.f32 %v1654_v51, %v1491_v34  ;;  %v1657_v41 = vadd.f32 %v1804_v18, %v1642_v39  ;;  %v1640_v45 = vmul.f32 %v1803_v6, %v1604_v37 }
 0x1ed   : > { %1670 = vst [vmem:[%s2554_s0] sm:$0xff] %v1662_v40  ;;  %v1665_v28 = vadd.f32 %v1657_v41, %v1494_v38  ;;  %v1655_v52 = vadd.f32 %v1804_v18, %v1640_v45 }
 0x1ef   : > { %1673 = vst [vmem:[%s2554_s0 + $0x18] sm:$0xff] %v1665_v28  ;;  %v1663_v33 = vadd.f32 %v1655_v52, %v1492_v3 }
 0x1f1   : > { %1671 = vst [vmem:[%s2554_s0 + $0x8] sm:$0xff] %v1663_v33 }
 0x1f7   : > { %v1988_v21 = vpop.f32.mrf.mxu1 }
 0x1f8   : > { %v1645_v20 = vmul.f32 %v1988_v21, %v1803_v6 }
 0x1f9   : > { %v1617_v62 = vpop.f32.mrf.mxu1 }
 0x1fa   : > { %v1660_v27 = vadd.f32 %v1804_v18, %v1645_v20  ;;  %v1643_v59 = vmul.f32 %v1803_v6, %v1617_v62 }
 0x1fb   : > { %v1989_v44 = vpop.f32.mrf.mxu1 }
 0x1fc   : > { %v1668_v22 = vadd.f32 %v1660_v27, %v1497_v57  ;;  %v1658_v2 = vadd.f32 %v1804_v18, %v1643_v59  ;;  %v1646_v31 = vmul.f32 %v1989_v44, %v1803_v6 }
 0x1fd   : > { %v1620_v26 = vpop.f32.mrf.mxu1 }
 0x1fe   : > { %1676 = vst [vmem:[%s2554_s0 + $0x30] sm:$0xff] %v1668_v22  ;;  %v1666_v5 = vadd.f32 %v1658_v2, %v1495_v43  ;;  %v1661_v58 = vadd.f32 %v1804_v18, %v1646_v31  ;;  %v1644_v10 = vmul.f32 %v1803_v6, %v1620_v26 }
 0x200   : > { %1674 = vst [vmem:[%s2554_s0 + $0x20] sm:$0xff] %v1666_v5  ;;  %v1669_v0 = vadd.f32 %v1661_v58, %v1498_v42  ;;  %v1659_v12 = vadd.f32 %v1804_v18, %v1644_v10 }
 0x202   : > { %1677 = vst [vmem:[%s2554_s0 + $0x38] sm:$0xff] %v1669_v0  ;;  %v1667_v13 = vadd.f32 %v1659_v12, %v1496_v11 }
 0x204   : > { %1675 = vst [vmem:[%s2554_s0 + $0x28] sm:$0xff] %v1667_v13 }
 0x205 PF: > { %s26_s21 = sadd.s32 1, %s2061_s21  }
 0x206   : > { %p23_p4 = scmp.ge.s32.totalorder %s26_s21, 4  }
 0x208   :  { %25 = sbr.rel (!%p23_p4) target bundleno = 2 (0x2), region = 119 }

</bundles_post_ra>
